<compile_context>
chip_gen: v5e
topology: v5e:2x2
jax: 0.10.0
libtpu: 0.0.40
codegen_flags: <defaults>
</compile_context>

<pallas_src>
import math

import jax
import jax.numpy as jnp
from jax import lax
from jax.experimental import pallas as pl
from jax.experimental.pallas import tpu as pltpu
import numpy as np

# ---- small ChatGLM2-style config (scaled down from hidden=4096 / 32 heads) ----
NP = 2            # num attention heads
NG = 1            # multi-query group num
HN = 128          # head dim (kept at 128 so the fixed 64-dim rotary matches)
H = NP * HN       # hidden size = 256
F = 256           # ffn hidden size
QW = NP * HN      # query width inside fused qkv projection
KW = NG * HN      # key / value width
ROT = 64          # rotary dims per head (first half of each head)
EPS = 1e-5
NEG_BIG = -1e30   # additive mask bias (finite: no -inf -> NaN hazard)


# ------------------------- traced helpers (in-kernel) -------------------------
def _rmsnorm(x, w):
    return x * lax.rsqrt(jnp.mean(x * x, axis=-1, keepdims=True) + EPS) * w


def _rope(x, cos_t, sin_even, sin_odd, width):
    """ChatGLM2 interleaved rotary on a flattened [seq, width] head layout.

    partner(even j) = x[j+1]  (roll by width-1),   weighted by sin_even = -sin
    partner(odd  j) = x[j-1]  (roll by +1),        weighted by sin_odd  = +sin
    Non-rotary lanes have cos = 1 and sin_* = 0 (identity).
    Rolls run on the XLU slot; no permutation matmul, no in-kernel iota.
    """
    return (x * cos_t
            + pltpu.roll(x, shift=width - 1, axis=1) * sin_even
            + pltpu.roll(x, shift=1, axis=1) * sin_odd)


# ---------------------------------- kernel ------------------------------------
def _make_kernel(has_final_ln):
    def kernel(hs_ref, bias_ref, pk_ref, pv_ref,
               cos_ref, sine_ref, sino_ref,
               ln1_ref, wqkv_ref, bqkv_ref, wo_ref,
               ln2_ref, w1_ref, w2_ref, *rest):
        if has_final_ln:
            fln_ref, out_h_ref, out_k_ref, out_v_ref = rest
        else:
            out_h_ref, out_k_ref, out_v_ref = rest

        x = hs_ref[...]                    # [SQ, H] f32
        SQ = x.shape[0]

        # ---- input RMSNorm + fused QKV projection (bf16 operands, f32 acc) ----
        xn = _rmsnorm(x, ln1_ref[...])
        qkv = jnp.dot(xn.astype(jnp.bfloat16), wqkv_ref[...],
                      preferred_element_type=jnp.float32) + bqkv_ref[...]
        q = qkv[:, :QW]
        k = qkv[:, QW:QW + KW]
        v = qkv[:, QW + KW:QW + 2 * KW]

        # ---- interleaved rotary (first 64 dims of each head), tables from host ----
        cq = cos_ref[...]                  # [SQ, QW]
        se = sine_ref[...]
        so = sino_ref[...]
        q = _rope(q, cq, se, so, QW)
        k = _rope(k, cq[:, :KW], se[:, :KW], so[:, :KW], KW)

        # ---- KV-cache concat in registers; presents written once (full stores) ----
        k_all = jnp.concatenate([pk_ref[...], k], axis=0)   # [SK, KW] f32
        v_all = jnp.concatenate([pv_ref[...], v], axis=0)
        out_k_ref[...] = k_all
        out_v_ref[...] = v_all

        # ---- multi-query attention (head loop unrolled, NP is small) ----
        bias = bias_ref[...]               # [SQ, SK] additive, -1e30 on masked
        scale = 1.0 / math.sqrt(HN)
        q_b = (q * scale).astype(jnp.bfloat16)
        k_b = k_all.astype(jnp.bfloat16)
        v_b = v_all.astype(jnp.bfloat16)
        rep = NP // NG
        ctx_list = []
        for h in range(NP):
            g = h // rep
            qh = q_b[:, h * HN:(h + 1) * HN]
            kg = k_b[:, g * HN:(g + 1) * HN]
            vg = v_b[:, g * HN:(g + 1) * HN]
            scores = lax.dot_general(qh, kg, (((1,), (1,)), ((), ())),
                                     preferred_element_type=jnp.float32) + bias
            m = jnp.max(scores, axis=-1, keepdims=True)
            e = jnp.exp(scores - m)
            inv = pl.reciprocal(jnp.sum(e, axis=-1, keepdims=True), approx=True)
            probs = (e * inv).astype(jnp.bfloat16)
            ctx_list.append(jnp.dot(probs, vg,
                                    preferred_element_type=jnp.float32))  # [SQ,HN]
        # fused output projection: one K=H contraction instead of NP small ones
        ctx_all = jnp.concatenate(ctx_list, axis=-1)                      # [SQ, H]
        attn_out = jnp.dot(ctx_all.astype(jnp.bfloat16), wo_ref[...],
                           preferred_element_type=jnp.float32)

        # ---- residual + post-attn RMSNorm + SwiGLU MLP + residual ----
        h1 = x + attn_out
        xn2 = _rmsnorm(h1, ln2_ref[...])
        a = jnp.dot(xn2.astype(jnp.bfloat16), w1_ref[...],
                    preferred_element_type=jnp.float32)
        gate, up = a[:, :F], a[:, F:]
        act = gate * jax.nn.sigmoid(gate) * up            # SiLU(gate) * up
        out = h1 + jnp.dot(act.astype(jnp.bfloat16), w2_ref[...],
                           preferred_element_type=jnp.float32)

        if has_final_ln:
            last = out[SQ - 1:SQ, :]                      # .view(-1, H)[-1]
            out_h_ref[...] = _rmsnorm(last, fln_ref[...])
        else:
            out_h_ref[...] = out
    return kernel


# --------------------------------- wrapper ------------------------------------
def _rope_tables(position_ids, sq):
    """Host/XLA-side cos / signed-sin tables broadcast to the flattened
    [seq, QW] head layout (identity on the non-rotary lanes)."""
    pos = position_ids.astype(jnp.float32).reshape(sq)            # [sq]
    d = jnp.arange(QW) % HN
    pair = (d // 2).astype(jnp.float32)
    theta = jnp.where(d < ROT, 10000.0 ** (-2.0 * pair / 64.0), 0.0)  # [QW]
    ang = pos[:, None] * theta[None, :]                            # [sq, QW]
    cos_t = jnp.cos(ang)
    sin_t = jnp.sin(ang)
    even = (d % 2 == 0)[None, :]
    sin_even = jnp.where(even, -sin_t, 0.0)    # weights roll(x, +1 lane ahead)
    sin_odd = jnp.where(even, 0.0, sin_t)      # weights roll(x, 1 lane behind)
    return cos_t, sin_even, sin_odd


def glm2_block_forward(hidden_states, attention_mask, position_ids, past_kv,
                       params, final_layernorm_weight=None):
    """hidden_states [sq,1,H] f32 ; attention_mask [1,1,sq,sk] bool (True=masked)
       position_ids [1,sq] int32  ; past_kv [2,past,1,NG,HN] f32
       returns (hidden_states_out, presents[2,sk,1,NG,HN])"""
    sq = hidden_states.shape[0]
    past = past_kv.shape[1]
    sk = past + sq
    has_final = final_layernorm_weight is not None

    x = hidden_states.reshape(sq, H).astype(jnp.float32)
    # additive attention bias (finite large-negative) instead of bool mask+select
    bias = jnp.where(attention_mask.reshape(sq, sk),
                     jnp.float32(NEG_BIG), jnp.float32(0.0))
    pk = past_kv[0].reshape(past, KW).astype(jnp.float32)
    pv = past_kv[1].reshape(past, KW).astype(jnp.float32)
    cos_t, sin_even, sin_odd = _rope_tables(position_ids, sq)

    bf = jnp.bfloat16
    inputs = [x, bias, pk, pv, cos_t, sin_even, sin_odd,
              params["ln1"].reshape(1, H),
              params["wqkv"].astype(bf),
              params["bqkv"].reshape(1, QW + 2 * KW),
              params["wo"].astype(bf),
              params["ln2"].reshape(1, H),
              params["w1"].astype(bf),
              params["w2"].astype(bf)]
    if has_final:
        inputs.append(final_layernorm_weight.reshape(1, H))

    out_rows = 1 if has_final else sq

    def full_spec(shape):
        nd = len(shape)
        return pl.BlockSpec(shape, lambda i, _nd=nd: (0,) * _nd)

    out_shapes = (jax.ShapeDtypeStruct((out_rows, H), jnp.float32),
                  jax.ShapeDtypeStruct((sk, KW), jnp.float32),
                  jax.ShapeDtypeStruct((sk, KW), jnp.float32))

    flops = (2 * sq * H * (QW + 2 * KW)          # qkv projection
             + 4 * NP * sq * sk * HN             # scores + ctx
             + 2 * sq * H * H                    # output projection
             + 2 * sq * H * 2 * F                # mlp up
             + 2 * sq * F * H)                   # mlp down
    transcendentals = NP * sq * sk + 2 * sq * F  # exp (softmax) + sigmoid
    bytes_accessed = int(sum(int(np.prod(a.shape)) * a.dtype.itemsize
                             for a in inputs)
                         + sum(int(np.prod(s.shape)) * 4 for s in out_shapes))

    out_h, k_all, v_all = pl.pallas_call(
        _make_kernel(has_final),
        grid=(1,),
        in_specs=[full_spec(a.shape) for a in inputs],
        out_specs=tuple(full_spec(s.shape) for s in out_shapes),
        out_shape=out_shapes,
        compiler_params=pltpu.CompilerParams(dimension_semantics=("arbitrary",)),
        cost_estimate=pl.CostEstimate(flops=flops,
                                      transcendentals=transcendentals,
                                      bytes_accessed=bytes_accessed),
    )(*inputs)

    hs_out = out_h.reshape(out_rows, 1, H)
    presents = jnp.stack([k_all, v_all]).reshape(2, sk, 1, NG, HN)
    return hs_out, presents


# ------------------------ pure-JAX reference (torch semantics) -----------------
def glm2_block_reference(hidden_states, attention_mask, position_ids, past_kv,
                         params, final_layernorm_weight=None):
    sq = hidden_states.shape[0]
    theta = 1.0 / 10000.0 ** (jnp.arange(0, 64, 2, dtype=jnp.float32) / 64.0)
    pos = position_ids.astype(jnp.float32).reshape(-1, 1)
    idx_theta = pos * theta
    cos, sin = jnp.cos(idx_theta), jnp.sin(idx_theta)           # [sq, 32]

    def rms(x, w):
        return x * lax.rsqrt(jnp.mean(x * x, -1, keepdims=True) + EPS) * w

    x = hidden_states.reshape(sq, H)
    xn = rms(x, params["ln1"])
    qkv = xn @ params["wqkv"] + params["bqkv"]
    q = qkv[:, :QW].reshape(sq, NP, HN)
    k = qkv[:, QW:QW + KW].reshape(sq, NG, HN)
    v = qkv[:, QW + KW:].reshape(sq, NG, HN)

    def rope(t):
        rot, pas = t[..., :ROT], t[..., ROT:]
        ts = rot.reshape(sq, -1, ROT // 2, 2)
        c, s = cos[:, None, :], sin[:, None, :]
        o0 = ts[..., 0] * c - ts[..., 1] * s
        o1 = ts[..., 1] * c + ts[..., 0] * s
        return jnp.concatenate(
            [jnp.stack([o0, o1], -1).reshape(sq, -1, ROT), pas], axis=-1)

    q, k = rope(q), rope(k)
    k_all = jnp.concatenate([past_kv[0, :, 0], k], axis=0)       # [sk, NG, HN]
    v_all = jnp.concatenate([past_kv[1, :, 0], v], axis=0)
    presents = jnp.stack([k_all, v_all])[:, :, None]             # [2, sk, 1, NG, HN]

    rep = NP // NG
    k_exp = jnp.repeat(k_all, rep, axis=1)
    v_exp = jnp.repeat(v_all, rep, axis=1)
    scores = jnp.einsum("qhd,khd->hqk", q, k_exp) / math.sqrt(HN)
    m2 = attention_mask.reshape(sq, -1)
    scores = jnp.where(m2[None], -jnp.inf, scores)
    probs = jax.nn.softmax(scores, axis=-1)
    ctx = jnp.einsum("hqk,khd->qhd", probs, v_exp).reshape(sq, QW)
    h1 = x + ctx @ params["wo"]
    xn2 = rms(h1, params["ln2"])
    a = xn2 @ params["w1"]
    out = h1 + (jax.nn.silu(a[:, :F]) * a[:, F:]) @ params["w2"]
    if final_layernorm_weight is not None:
        return rms(out, final_layernorm_weight)[-1:].reshape(1, 1, H), presents
    return out.reshape(sq, 1, H), presents


if __name__ == "__main__":
    key = jax.random.PRNGKey(0)
    ks = jax.random.split(key, 10)
    sq, past = 8, 4
    sk = sq + past

    # deterministic synthetic parameters (shapes follow ChatGLM2 GLMBlock, scaled down)
    params = {
        "ln1": 1.0 + 0.05 * jax.random.normal(ks[0], (H,), jnp.float32),
        "wqkv": 0.05 * jax.random.normal(ks[1], (H, QW + 2 * KW), jnp.float32),
        "bqkv": 0.05 * jax.random.normal(ks[2], (QW + 2 * KW,), jnp.float32),
        "wo": 0.05 * jax.random.normal(ks[3], (QW, H), jnp.float32),
        "ln2": 1.0 + 0.05 * jax.random.normal(ks[4], (H,), jnp.float32),
        "w1": 0.05 * jax.random.normal(ks[5], (H, 2 * F), jnp.float32),
        "w2": 0.05 * jax.random.normal(ks[6], (F, H), jnp.float32),
    }
    final_ln_w = 1.0 + 0.05 * jax.random.normal(ks[7], (H,), jnp.float32)

    hidden_states = jax.random.normal(ks[8], (sq, 1, H), jnp.float32)
    position_ids = jnp.arange(past, past + sq, dtype=jnp.int32).reshape(1, sq)
    row = jnp.arange(sq)[:, None]
    col = jnp.arange(sk)[None, :]
    attention_mask = (col > (past + row)).reshape(1, 1, sq, sk)   # True = masked out
    past_kv = 0.5 * jax.random.normal(ks[9], (2, past, 1, NG, HN), jnp.float32)

    # run both an intermediate block (final_layernorm=None) and a final block
    # tolerance 2e-2: kernel matmuls use bf16 operands (f32 accumulation) vs the
    # full-f32 reference.
    for fln in (None, final_ln_w):
        out_h, presents = glm2_block_forward(hidden_states, attention_mask,
                                             position_ids, past_kv, params, fln)
        jax.block_until_ready((out_h, presents))
        ref_h, ref_p = glm2_block_reference(hidden_states, attention_mask,
                                            position_ids, past_kv, params, fln)
        np.testing.assert_allclose(np.asarray(out_h), np.asarray(ref_h),
                                   rtol=2e-2, atol=2e-2)
        np.testing.assert_allclose(np.asarray(presents), np.asarray(ref_p),
                                   rtol=2e-2, atol=2e-2)

    print("KERNEL_OK")
</pallas_src>

<mosaic_0001>
module attributes {stable_mosaic.version = 11 : i64} {
  func.func @kernel(%arg0: i32, %arg1: memref<8x256xf32, #tpu.memory_space<vmem>>, %arg2: memref<8x12xf32, #tpu.memory_space<vmem>>, %arg3: memref<4x128xf32, #tpu.memory_space<vmem>>, %arg4: memref<4x128xf32, #tpu.memory_space<vmem>>, %arg5: memref<8x256xf32, #tpu.memory_space<vmem>>, %arg6: memref<8x256xf32, #tpu.memory_space<vmem>>, %arg7: memref<8x256xf32, #tpu.memory_space<vmem>>, %arg8: memref<1x256xf32, #tpu.memory_space<vmem>>, %arg9: memref<256x512xbf16, #tpu.memory_space<vmem>>, %arg10: memref<1x512xf32, #tpu.memory_space<vmem>>, %arg11: memref<256x256xbf16, #tpu.memory_space<vmem>>, %arg12: memref<1x256xf32, #tpu.memory_space<vmem>>, %arg13: memref<256x512xbf16, #tpu.memory_space<vmem>>, %arg14: memref<256x256xbf16, #tpu.memory_space<vmem>>, %arg15: memref<8x256xf32, #tpu.memory_space<vmem>>, %arg16: memref<12x128xf32, #tpu.memory_space<vmem>>, %arg17: memref<12x128xf32, #tpu.memory_space<vmem>>) attributes {dimension_semantics = [#tpu.dimension_semantics<arbitrary>], iteration_bounds = array<i64: 1>, scalar_prefetch = 0 : i64, scratch_operands = 0 : i64, tpu.core_type = #tpu.core_type<tc>, window_params = [{pipeline_mode = #tpu.pipeline_mode<synchronous>, transform_indices = @transform_0, window_bounds = array<i64: 8, 256>}, {pipeline_mode = #tpu.pipeline_mode<synchronous>, transform_indices = @transform_1, window_bounds = array<i64: 8, 12>}, {pipeline_mode = #tpu.pipeline_mode<synchronous>, transform_indices = @transform_2, window_bounds = array<i64: 4, 128>}, {pipeline_mode = #tpu.pipeline_mode<synchronous>, transform_indices = @transform_3, window_bounds = array<i64: 4, 128>}, {pipeline_mode = #tpu.pipeline_mode<synchronous>, transform_indices = @transform_4, window_bounds = array<i64: 8, 256>}, {pipeline_mode = #tpu.pipeline_mode<synchronous>, transform_indices = @transform_5, window_bounds = array<i64: 8, 256>}, {pipeline_mode = #tpu.pipeline_mode<synchronous>, transform_indices = @transform_6, window_bounds = array<i64: 8, 256>}, {pipeline_mode = #tpu.pipeline_mode<synchronous>, transform_indices = @transform_7, window_bounds = array<i64: 1, 256>}, {pipeline_mode = #tpu.pipeline_mode<synchronous>, transform_indices = @transform_8, window_bounds = array<i64: 256, 512>}, {pipeline_mode = #tpu.pipeline_mode<synchronous>, transform_indices = @transform_9, window_bounds = array<i64: 1, 512>}, {pipeline_mode = #tpu.pipeline_mode<synchronous>, transform_indices = @transform_10, window_bounds = array<i64: 256, 256>}, {pipeline_mode = #tpu.pipeline_mode<synchronous>, transform_indices = @transform_11, window_bounds = array<i64: 1, 256>}, {pipeline_mode = #tpu.pipeline_mode<synchronous>, transform_indices = @transform_12, window_bounds = array<i64: 256, 512>}, {pipeline_mode = #tpu.pipeline_mode<synchronous>, transform_indices = @transform_13, window_bounds = array<i64: 256, 256>}, {pipeline_mode = #tpu.pipeline_mode<synchronous>, transform_indices = @transform_14, window_bounds = array<i64: 8, 256>}, {pipeline_mode = #tpu.pipeline_mode<synchronous>, transform_indices = @transform_15, window_bounds = array<i64: 12, 128>}, {pipeline_mode = #tpu.pipeline_mode<synchronous>, transform_indices = @transform_16, window_bounds = array<i64: 12, 128>}]} {
    %c0 = arith.constant 0 : index
    %c0_0 = arith.constant 0 : index
    %0 = vector.load %arg1[%c0, %c0_0] : memref<8x256xf32, #tpu.memory_space<vmem>>, vector<8x256xf32>
    %c0_1 = arith.constant 0 : index
    %c0_2 = arith.constant 0 : index
    %1 = vector.load %arg8[%c0_1, %c0_2] : memref<1x256xf32, #tpu.memory_space<vmem>>, vector<1x256xf32>
    %2 = arith.mulf %0, %0 : vector<8x256xf32>
    %cst = arith.constant dense<0.000000e+00> : vector<8xf32>
    %3 = vector.multi_reduction <add>, %2, %cst [1] : vector<8x256xf32> to vector<8xf32>
    %4 = vector.shape_cast %3 : vector<8xf32> to vector<8x1xf32>
    %cst_3 = arith.constant 2.560000e+02 : f32
    %5 = vector.broadcast %cst_3 : f32 to vector<8x1xf32>
    %6 = arith.divf %4, %5 : vector<8x1xf32>
    %cst_4 = arith.constant 9.99999974E-6 : f32
    %7 = vector.broadcast %cst_4 : f32 to vector<8x1xf32>
    %8 = arith.addf %6, %7 : vector<8x1xf32>
    %9 = math.rsqrt %8 : vector<8x1xf32>
    %10 = vector.broadcast %9 : vector<8x1xf32> to vector<8x256xf32>
    %11 = arith.mulf %0, %10 : vector<8x256xf32>
    %12 = vector.broadcast %1 : vector<1x256xf32> to vector<8x256xf32>
    %13 = arith.mulf %11, %12 : vector<8x256xf32>
    %14 = arith.truncf %13 : vector<8x256xf32> to vector<8x256xbf16>
    %c0_5 = arith.constant 0 : index
    %c0_6 = arith.constant 0 : index
    %15 = vector.load %arg9[%c0_5, %c0_6] : memref<256x512xbf16, #tpu.memory_space<vmem>>, vector<256x512xbf16>
    %cst_7 = arith.constant dense<0.000000e+00> : vector<8x512xf32>
    %16 = tpu.matmul %14, %15, %cst_7 {dimension_numbers = #tpu.dot_dimension_numbers<[1], [0], [0], [1], [0, 0, 1, 1], [], []>} : vector<8x256xbf16>, vector<256x512xbf16>, vector<8x512xf32> -> vector<8x512xf32>
    %c0_8 = arith.constant 0 : index
    %c0_9 = arith.constant 0 : index
    %17 = vector.load %arg10[%c0_8, %c0_9] : memref<1x512xf32, #tpu.memory_space<vmem>>, vector<1x512xf32>
    %18 = vector.broadcast %17 : vector<1x512xf32> to vector<8x512xf32>
    %19 = arith.addf %16, %18 : vector<8x512xf32>
    %20 = vector.extract_strided_slice %19 {offsets = [0, 0], sizes = [8, 256], strides = [1, 1]} : vector<8x512xf32> to vector<8x256xf32>
    %21 = vector.extract_strided_slice %19 {offsets = [0, 256], sizes = [8, 128], strides = [1, 1]} : vector<8x512xf32> to vector<8x128xf32>
    %22 = vector.extract_strided_slice %19 {offsets = [0, 384], sizes = [8, 128], strides = [1, 1]} : vector<8x512xf32> to vector<8x128xf32>
    %c0_10 = arith.constant 0 : index
    %c0_11 = arith.constant 0 : index
    %23 = vector.load %arg5[%c0_10, %c0_11] : memref<8x256xf32, #tpu.memory_space<vmem>>, vector<8x256xf32>
    %c0_12 = arith.constant 0 : index
    %c0_13 = arith.constant 0 : index
    %24 = vector.load %arg6[%c0_12, %c0_13] : memref<8x256xf32, #tpu.memory_space<vmem>>, vector<8x256xf32>
    %c0_14 = arith.constant 0 : index
    %c0_15 = arith.constant 0 : index
    %25 = vector.load %arg7[%c0_14, %c0_15] : memref<8x256xf32, #tpu.memory_space<vmem>>, vector<8x256xf32>
    %26 = arith.mulf %20, %23 : vector<8x256xf32>
    %c255_i32 = arith.constant 255 : i32
    %27 = tpu.dynamic_rotate %20 by %c255_i32 dim 1 : vector<8x256xf32>, i32 -> vector<8x256xf32>
    %28 = arith.mulf %27, %24 : vector<8x256xf32>
    %29 = arith.addf %26, %28 : vector<8x256xf32>
    %c1_i32 = arith.constant 1 : i32
    %30 = tpu.dynamic_rotate %20 by %c1_i32 dim 1 : vector<8x256xf32>, i32 -> vector<8x256xf32>
    %31 = arith.mulf %30, %25 : vector<8x256xf32>
    %32 = arith.addf %29, %31 : vector<8x256xf32>
    %33 = vector.extract_strided_slice %23 {offsets = [0, 0], sizes = [8, 128], strides = [1, 1]} : vector<8x256xf32> to vector<8x128xf32>
    %34 = vector.extract_strided_slice %24 {offsets = [0, 0], sizes = [8, 128], strides = [1, 1]} : vector<8x256xf32> to vector<8x128xf32>
    %35 = vector.extract_strided_slice %25 {offsets = [0, 0], sizes = [8, 128], strides = [1, 1]} : vector<8x256xf32> to vector<8x128xf32>
    %36 = arith.mulf %21, %33 : vector<8x128xf32>
    %c127_i32 = arith.constant 127 : i32
    %37 = tpu.dynamic_rotate %21 by %c127_i32 dim 1 : vector<8x128xf32>, i32 -> vector<8x128xf32>
    %38 = arith.mulf %37, %34 : vector<8x128xf32>
    %39 = arith.addf %36, %38 : vector<8x128xf32>
    %c1_i32_16 = arith.constant 1 : i32
    %40 = tpu.dynamic_rotate %21 by %c1_i32_16 dim 1 : vector<8x128xf32>, i32 -> vector<8x128xf32>
    %41 = arith.mulf %40, %35 : vector<8x128xf32>
    %42 = arith.addf %39, %41 : vector<8x128xf32>
    %c0_17 = arith.constant 0 : index
    %c0_18 = arith.constant 0 : index
    %43 = vector.load %arg3[%c0_17, %c0_18] : memref<4x128xf32, #tpu.memory_space<vmem>>, vector<4x128xf32>
    %44 = tpu.concatenate %43, %42 in 0 : vector<4x128xf32>, vector<8x128xf32> -> vector<12x128xf32>
    %c0_19 = arith.constant 0 : index
    %c0_20 = arith.constant 0 : index
    %45 = vector.load %arg4[%c0_19, %c0_20] : memref<4x128xf32, #tpu.memory_space<vmem>>, vector<4x128xf32>
    %46 = tpu.concatenate %45, %22 in 0 : vector<4x128xf32>, vector<8x128xf32> -> vector<12x128xf32>
    %c0_21 = arith.constant 0 : index
    %c0_22 = arith.constant 0 : index
    %47 = vector.load %arg16[%c0_21, %c0_22] : memref<12x128xf32, #tpu.memory_space<vmem>>, vector<12x128xf32>
    tpu.vector_store %arg16[%c0_21, %c0_22], %44 {strides = array<i32>} : memref<12x128xf32, #tpu.memory_space<vmem>>, vector<12x128xf32>,
    %c0_23 = arith.constant 0 : index
    %c0_24 = arith.constant 0 : index
    %48 = vector.load %arg17[%c0_23, %c0_24] : memref<12x128xf32, #tpu.memory_space<vmem>>, vector<12x128xf32>
    tpu.vector_store %arg17[%c0_23, %c0_24], %46 {strides = array<i32>} : memref<12x128xf32, #tpu.memory_space<vmem>>, vector<12x128xf32>,
    %c0_25 = arith.constant 0 : index
    %c0_26 = arith.constant 0 : index
    %49 = vector.load %arg2[%c0_25, %c0_26] : memref<8x12xf32, #tpu.memory_space<vmem>>, vector<8x12xf32>
    %cst_27 = arith.constant 0.0883883461 : f32
    %50 = vector.broadcast %cst_27 : f32 to vector<8x256xf32>
    %51 = arith.mulf %32, %50 : vector<8x256xf32>
    %52 = arith.truncf %51 : vector<8x256xf32> to vector<8x256xbf16>
    %53 = arith.truncf %44 : vector<12x128xf32> to vector<12x128xbf16>
    %54 = arith.truncf %46 : vector<12x128xf32> to vector<12x128xbf16>
    %55 = vector.extract_strided_slice %52 {offsets = [0, 0], sizes = [8, 128], strides = [1, 1]} : vector<8x256xbf16> to vector<8x128xbf16>
    %cst_28 = arith.constant dense<0.000000e+00> : vector<8x12xf32>
    %56 = tpu.matmul %55, %53, %cst_28 {dimension_numbers = #tpu.dot_dimension_numbers<[1], [1], [0], [0], [0, 0, 1, 0], [], []>} : vector<8x128xbf16>, vector<12x128xbf16>, vector<8x12xf32> -> vector<8x12xf32>
    %57 = arith.addf %56, %49 : vector<8x12xf32>
    %cst_29 = arith.constant dense<0xFF800000> : vector<8xf32>
    %58 = vector.multi_reduction <maximumf>, %57, %cst_29 [1] : vector<8x12xf32> to vector<8xf32>
    %59 = vector.shape_cast %58 : vector<8xf32> to vector<8x1xf32>
    %60 = vector.broadcast %59 : vector<8x1xf32> to vector<8x12xf32>
    %61 = arith.subf %57, %60 : vector<8x12xf32>
    %62 = math.exp %61 : vector<8x12xf32>
    %cst_30 = arith.constant dense<0.000000e+00> : vector<8xf32>
    %63 = vector.multi_reduction <add>, %62, %cst_30 [1] : vector<8x12xf32> to vector<8xf32>
    %64 = vector.shape_cast %63 : vector<8xf32> to vector<8x1xf32>
    %65 = tpu.reciprocal %64 {approx = true} : vector<8x1xf32> -> vector<8x1xf32>
    %66 = vector.broadcast %65 : vector<8x1xf32> to vector<8x12xf32>
    %67 = arith.mulf %62, %66 : vector<8x12xf32>
    %68 = arith.truncf %67 : vector<8x12xf32> to vector<8x12xbf16>
    %cst_31 = arith.constant dense<0.000000e+00> : vector<8x128xf32>
    %69 = tpu.matmul %68, %54, %cst_31 {dimension_numbers = #tpu.dot_dimension_numbers<[1], [0], [0], [1], [0, 0, 1, 1], [], []>} : vector<8x12xbf16>, vector<12x128xbf16>, vector<8x128xf32> -> vector<8x128xf32>
    %70 = vector.extract_strided_slice %52 {offsets = [0, 128], sizes = [8, 128], strides = [1, 1]} : vector<8x256xbf16> to vector<8x128xbf16>
    %cst_32 = arith.constant dense<0.000000e+00> : vector<8x12xf32>
    %71 = tpu.matmul %70, %53, %cst_32 {dimension_numbers = #tpu.dot_dimension_numbers<[1], [1], [0], [0], [0, 0, 1, 0], [], []>} : vector<8x128xbf16>, vector<12x128xbf16>, vector<8x12xf32> -> vector<8x12xf32>
    %72 = arith.addf %71, %49 : vector<8x12xf32>
    %cst_33 = arith.constant dense<0xFF800000> : vector<8xf32>
    %73 = vector.multi_reduction <maximumf>, %72, %cst_33 [1] : vector<8x12xf32> to vector<8xf32>
    %74 = vector.shape_cast %73 : vector<8xf32> to vector<8x1xf32>
    %75 = vector.broadcast %74 : vector<8x1xf32> to vector<8x12xf32>
    %76 = arith.subf %72, %75 : vector<8x12xf32>
    %77 = math.exp %76 : vector<8x12xf32>
    %cst_34 = arith.constant dense<0.000000e+00> : vector<8xf32>
    %78 = vector.multi_reduction <add>, %77, %cst_34 [1] : vector<8x12xf32> to vector<8xf32>
    %79 = vector.shape_cast %78 : vector<8xf32> to vector<8x1xf32>
    %80 = tpu.reciprocal %79 {approx = true} : vector<8x1xf32> -> vector<8x1xf32>
    %81 = vector.broadcast %80 : vector<8x1xf32> to vector<8x12xf32>
    %82 = arith.mulf %77, %81 : vector<8x12xf32>
    %83 = arith.truncf %82 : vector<8x12xf32> to vector<8x12xbf16>
    %cst_35 = arith.constant dense<0.000000e+00> : vector<8x128xf32>
    %84 = tpu.matmul %83, %54, %cst_35 {dimension_numbers = #tpu.dot_dimension_numbers<[1], [0], [0], [1], [0, 0, 1, 1], [], []>} : vector<8x12xbf16>, vector<12x128xbf16>, vector<8x128xf32> -> vector<8x128xf32>
    %85 = tpu.concatenate %69, %84 in 1 : vector<8x128xf32>, vector<8x128xf32> -> vector<8x256xf32>
    %86 = arith.truncf %85 : vector<8x256xf32> to vector<8x256xbf16>
    %c0_36 = arith.constant 0 : index
    %c0_37 = arith.constant 0 : index
    %87 = vector.load %arg11[%c0_36, %c0_37] : memref<256x256xbf16, #tpu.memory_space<vmem>>, vector<256x256xbf16>
    %cst_38 = arith.constant dense<0.000000e+00> : vector<8x256xf32>
    %88 = tpu.matmul %86, %87, %cst_38 {dimension_numbers = #tpu.dot_dimension_numbers<[1], [0], [0], [1], [0, 0, 1, 1], [], []>} : vector<8x256xbf16>, vector<256x256xbf16>, vector<8x256xf32> -> vector<8x256xf32>
    %89 = arith.addf %0, %88 : vector<8x256xf32>
    %c0_39 = arith.constant 0 : index
    %c0_40 = arith.constant 0 : index
    %90 = vector.load %arg12[%c0_39, %c0_40] : memref<1x256xf32, #tpu.memory_space<vmem>>, vector<1x256xf32>
    %91 = arith.mulf %89, %89 : vector<8x256xf32>
    %cst_41 = arith.constant dense<0.000000e+00> : vector<8xf32>
    %92 = vector.multi_reduction <add>, %91, %cst_41 [1] : vector<8x256xf32> to vector<8xf32>
    %93 = vector.shape_cast %92 : vector<8xf32> to vector<8x1xf32>
    %cst_42 = arith.constant 2.560000e+02 : f32
    %94 = vector.broadcast %cst_42 : f32 to vector<8x1xf32>
    %95 = arith.divf %93, %94 : vector<8x1xf32>
    %cst_43 = arith.constant 9.99999974E-6 : f32
    %96 = vector.broadcast %cst_43 : f32 to vector<8x1xf32>
    %97 = arith.addf %95, %96 : vector<8x1xf32>
    %98 = math.rsqrt %97 : vector<8x1xf32>
    %99 = vector.broadcast %98 : vector<8x1xf32> to vector<8x256xf32>
    %100 = arith.mulf %89, %99 : vector<8x256xf32>
    %101 = vector.broadcast %90 : vector<1x256xf32> to vector<8x256xf32>
    %102 = arith.mulf %100, %101 : vector<8x256xf32>
    %103 = arith.truncf %102 : vector<8x256xf32> to vector<8x256xbf16>
    %c0_44 = arith.constant 0 : index
    %c0_45 = arith.constant 0 : index
    %104 = vector.load %arg13[%c0_44, %c0_45] : memref<256x512xbf16, #tpu.memory_space<vmem>>, vector<256x512xbf16>
    %cst_46 = arith.constant dense<0.000000e+00> : vector<8x512xf32>
    %105 = tpu.matmul %103, %104, %cst_46 {dimension_numbers = #tpu.dot_dimension_numbers<[1], [0], [0], [1], [0, 0, 1, 1], [], []>} : vector<8x256xbf16>, vector<256x512xbf16>, vector<8x512xf32> -> vector<8x512xf32>
    %106 = vector.extract_strided_slice %105 {offsets = [0, 0], sizes = [8, 256], strides = [1, 1]} : vector<8x512xf32> to vector<8x256xf32>
    %107 = vector.extract_strided_slice %105 {offsets = [0, 256], sizes = [8, 256], strides = [1, 1]} : vector<8x512xf32> to vector<8x256xf32>
    %108 = arith.negf %106 : vector<8x256xf32>
    %109 = math.exp %108 : vector<8x256xf32>
    %cst_47 = arith.constant 1.000000e+00 : f32
    %110 = vector.broadcast %cst_47 : f32 to vector<8x256xf32>
    %111 = arith.addf %110, %109 : vector<8x256xf32>
    %112 = arith.divf %110, %111 : vector<8x256xf32>
    %113 = arith.mulf %106, %112 : vector<8x256xf32>
    %114 = arith.mulf %113, %107 : vector<8x256xf32>
    %115 = arith.truncf %114 : vector<8x256xf32> to vector<8x256xbf16>
    %c0_48 = arith.constant 0 : index
    %c0_49 = arith.constant 0 : index
    %116 = vector.load %arg14[%c0_48, %c0_49] : memref<256x256xbf16, #tpu.memory_space<vmem>>, vector<256x256xbf16>
    %cst_50 = arith.constant dense<0.000000e+00> : vector<8x256xf32>
    %117 = tpu.matmul %115, %116, %cst_50 {dimension_numbers = #tpu.dot_dimension_numbers<[1], [0], [0], [1], [0, 0, 1, 1], [], []>} : vector<8x256xbf16>, vector<256x256xbf16>, vector<8x256xf32> -> vector<8x256xf32>
    %118 = arith.addf %89, %117 : vector<8x256xf32>
    %c0_51 = arith.constant 0 : index
    %c0_52 = arith.constant 0 : index
    %119 = vector.load %arg15[%c0_51, %c0_52] : memref<8x256xf32, #tpu.memory_space<vmem>>, vector<8x256xf32>
    tpu.vector_store %arg15[%c0_51, %c0_52], %118 {strides = array<i32>} : memref<8x256xf32, #tpu.memory_space<vmem>>, vector<8x256xf32>,
    return
  }
  func.func @transform_0(%arg0: i32) -> (i32, i32) {
    %c0_i32 = arith.constant 0 : i32
    %c0_i32_0 = arith.constant 0 : i32
    %c0_i32_1 = arith.constant 0 : i32
    return %c0_i32, %c0_i32_0 : i32, i32
  }
  func.func @transform_1(%arg0: i32) -> (i32, i32) {
    %c0_i32 = arith.constant 0 : i32
    %c0_i32_0 = arith.constant 0 : i32
    %c0_i32_1 = arith.constant 0 : i32
    return %c0_i32, %c0_i32_0 : i32, i32
  }
  func.func @transform_2(%arg0: i32) -> (i32, i32) {
    %c0_i32 = arith.constant 0 : i32
    %c0_i32_0 = arith.constant 0 : i32
    %c0_i32_1 = arith.constant 0 : i32
    return %c0_i32, %c0_i32_0 : i32, i32
  }
  func.func @transform_3(%arg0: i32) -> (i32, i32) {
    %c0_i32 = arith.constant 0 : i32
    %c0_i32_0 = arith.constant 0 : i32
    %c0_i32_1 = arith.constant 0 : i32
    return %c0_i32, %c0_i32_0 : i32, i32
  }
  func.func @transform_4(%arg0: i32) -> (i32, i32) {
    %c0_i32 = arith.constant 0 : i32
    %c0_i32_0 = arith.constant 0 : i32
    %c0_i32_1 = arith.constant 0 : i32
    return %c0_i32, %c0_i32_0 : i32, i32
  }
  func.func @transform_5(%arg0: i32) -> (i32, i32) {
    %c0_i32 = arith.constant 0 : i32
    %c0_i32_0 = arith.constant 0 : i32
    %c0_i32_1 = arith.constant 0 : i32
    return %c0_i32, %c0_i32_0 : i32, i32
  }
  func.func @transform_6(%arg0: i32) -> (i32, i32) {
    %c0_i32 = arith.constant 0 : i32
    %c0_i32_0 = arith.constant 0 : i32
    %c0_i32_1 = arith.constant 0 : i32
    return %c0_i32, %c0_i32_0 : i32, i32
  }
  func.func @transform_7(%arg0: i32) -> (i32, i32) {
    %c0_i32 = arith.constant 0 : i32
    %c0_i32_0 = arith.constant 0 : i32
    %c0_i32_1 = arith.constant 0 : i32
    return %c0_i32, %c0_i32_0 : i32, i32
  }
  func.func @transform_8(%arg0: i32) -> (i32, i32) {
    %c0_i32 = arith.constant 0 : i32
    %c0_i32_0 = arith.constant 0 : i32
    %c0_i32_1 = arith.constant 0 : i32
    return %c0_i32, %c0_i32_0 : i32, i32
  }
  func.func @transform_9(%arg0: i32) -> (i32, i32) {
    %c0_i32 = arith.constant 0 : i32
    %c0_i32_0 = arith.constant 0 : i32
    %c0_i32_1 = arith.constant 0 : i32
    return %c0_i32, %c0_i32_0 : i32, i32
  }
  func.func @transform_10(%arg0: i32) -> (i32, i32) {
    %c0_i32 = arith.constant 0 : i32
    %c0_i32_0 = arith.constant 0 : i32
    %c0_i32_1 = arith.constant 0 : i32
    return %c0_i32, %c0_i32_0 : i32, i32
  }
  func.func @transform_11(%arg0: i32) -> (i32, i32) {
    %c0_i32 = arith.constant 0 : i32
    %c0_i32_0 = arith.constant 0 : i32
    %c0_i32_1 = arith.constant 0 : i32
    return %c0_i32, %c0_i32_0 : i32, i32
  }
  func.func @transform_12(%arg0: i32) -> (i32, i32) {
    %c0_i32 = arith.constant 0 : i32
    %c0_i32_0 = arith.constant 0 : i32
    %c0_i32_1 = arith.constant 0 : i32
    return %c0_i32, %c0_i32_0 : i32, i32
  }
  func.func @transform_13(%arg0: i32) -> (i32, i32) {
    %c0_i32 = arith.constant 0 : i32
    %c0_i32_0 = arith.constant 0 : i32
    %c0_i32_1 = arith.constant 0 : i32
    return %c0_i32, %c0_i32_0 : i32, i32
  }
  func.func @transform_14(%arg0: i32) -> (i32, i32) {
    %c0_i32 = arith.constant 0 : i32
    %c0_i32_0 = arith.constant 0 : i32
    %c0_i32_1 = arith.constant 0 : i32
    return %c0_i32, %c0_i32_0 : i32, i32
  }
  func.func @transform_15(%arg0: i32) -> (i32, i32) {
    %c0_i32 = arith.constant 0 : i32
    %c0_i32_0 = arith.constant 0 : i32
    %c0_i32_1 = arith.constant 0 : i32
    return %c0_i32, %c0_i32_0 : i32, i32
  }
  func.func @transform_16(%arg0: i32) -> (i32, i32) {
    %c0_i32 = arith.constant 0 : i32
    %c0_i32_0 = arith.constant 0 : i32
    %c0_i32_1 = arith.constant 0 : i32
    return %c0_i32, %c0_i32_0 : i32, i32
  }
}

</mosaic_0001>

<bundles_post_ra>
// kernel: tpu_custom_call.1
= control target key start
LH: loop header
LB: loop body
LE: loop exit
PB: predicated region body
PF: predicated region fallthrough
CT: control target
= control target key end

     0   :  { %s3604_s0 = inlined_call_operand.hbm [shape: f32[8,256], index: 0, kind: input, shape index: {}]   ;;  %s3605_s1 = inlined_call_operand.hbm [shape: f32[8,12], index: 1, kind: input, shape index: {}]   ;;  %s3606_s2 = inlined_call_operand.hbm [shape: f32[4,128], index: 2, kind: input, shape index: {}]   ;;  %s3607_s3 = inlined_call_operand.hbm [shape: f32[4,128], index: 3, kind: input, shape index: {}]   ;;  %s3608_s4 = inlined_call_operand.hbm [shape: f32[8,256], index: 4, kind: input, shape index: {}]   ;;  %s3609_s5 = inlined_call_operand.hbm [shape: f32[8,256], index: 5, kind: input, shape index: {}]   ;;  %s3610_s6 = inlined_call_operand.hbm [shape: f32[8,256], index: 6, kind: input, shape index: {}]   ;;  %s3611_s7 = inlined_call_operand.vmem [shape: f32[1,256], index: 7, kind: input, shape index: {}]   ;;  %s3612_s8 = inlined_call_operand.hbm [shape: bf16[256,512], index: 8, kind: input, shape index: {}]   ;;  %s3613_s9 = inlined_call_operand.vmem [shape: f32[1,512], index: 9, kind: input, shape index: {}]   ;;  %s3614_s10 = inlined_call_operand.hbm [shape: bf16[256,256], index: 10, kind: input, shape index: {}]   ;;  %s3615_s11 = inlined_call_operand.vmem [shape: f32[1,256], index: 11, kind: input, shape index: {}]   ;;  %s3616_s12 = inlined_call_operand.hbm [shape: bf16[256,512], index: 12, kind: input, shape index: {}]   ;;  %s3617_s13 = inlined_call_operand.hbm [shape: bf16[256,256], index: 13, kind: input, shape index: {}]   ;;  %s3618_s14 = inlined_call_operand.hbm [shape: f32[8,256], index: 14, kind: output, shape index: {0}]   ;;  %s3619_s15 = inlined_call_operand.hbm [shape: f32[12,128], index: 15, kind: output, shape index: {1}]   ;;  %s3620_s16 = inlined_call_operand.hbm [shape: f32[12,128], index: 16, kind: output, shape index: {2}]  }
   0x1   :  { %3621 = sst [smem:[#allocation32_spill]] %s3604_s0 }
   0x2   :  { %22 = vsyncpa [#allocation3], 0 }
   0x3   :  { %23 = vsyncpa [#allocation6], 0 }
   0x4   :  { %24 = vsyncpa [#allocation9], 0 }
   0x5   :  { %25 = vsyncpa [#allocation12], 0 }
   0x6   :  { %26 = vsyncpa [#allocation15], 0 }
   0x7   :  { %27 = vsyncpa [#allocation18], 0 }
   0x8   :  { %28 = vsyncpa [#allocation4], 0  ;;  %s46_s23 = sshll.u32 %s3605_s1, 4  ;;  %s47_s23 = int_to_ptr.hbm [resolvable:$true] %s46_s23 }
   0x9   :  { %29 = vsyncpa [#allocation22], 0  ;;  %s3374_s24 = smov [#allocation5]   ;;  %s68_s28 = sshll.u32 %s3607_s3, 4  ;;  %s69_s28 = int_to_ptr.hbm [resolvable:$true] %s68_s28 }
   0xa   :  { %s48_s25 = sshll.u32 %s3374_s24, 4  ;;  %s3375_s29 = smov [#allocation8]   ;;  %s49_s25 = int_to_ptr.vmem [resolvable:$true] %s48_s25 }
   0xb   :  { %51 = dma.hbm_to_vmem [thread:$0]  %s47_s23, 128, %s49_s25, [#allocation6]  }
   0xc   :  { %s70_s30 = sshll.u32 %s3375_s29, 4  ;;  %s90_s18 = sshll.u32 %s3609_s5, 4  ;;  %s71_s30 = int_to_ptr.vmem [resolvable:$true] %s70_s30  ;;  %s91_s18 = int_to_ptr.hbm [resolvable:$true] %s90_s18 }
   0xd   :  { %73 = dma.hbm_to_vmem [thread:$0]  %s69_s28, 64, %s71_s30, [#allocation9]  }
   0xe   :  { %s113_s20 = sshll.u32 %s3612_s8, 4  ;;  %s3376_s21 = smov [#allocation11]   ;;  %s114_s20 = int_to_ptr.hbm [resolvable:$true] %s113_s20 }
   0xf   :  { %s92_s22 = sshll.u32 %s3376_s21, 4  ;;  %s3377_s3 = smov [#allocation14]   ;;  %s93_s22 = int_to_ptr.vmem [resolvable:$true] %s92_s22 }
  0x10   :  { %95 = dma.hbm_to_vmem [thread:$0]  %s91_s18, 256, %s93_s22, [#allocation12]  }
  0x11   :  { %s115_s23 = sshll.u32 %s3377_s3, 4  ;;  %s3378_s24 = smov 256   ;;  %s116_s23 = int_to_ptr.vmem [resolvable:$true] %s115_s23 }
  0x12   :  { %s3379_s25 = smov 16   ;;  %s143_s27 = sshll.u32 %s3616_s12, 4  ;;  %s144_s27 = int_to_ptr.hbm [resolvable:$true] %s143_s27 }
  0x13   :  { %121 = dma.hbm_to_vmem [thread:$0]  %s114_s20, 8192, %s116_s23, [#allocation15], %s3378_s24, %s3378_s24, %s3379_s25  }
  0x14   :  { %s3380_s28 = smov [#allocation17]   ;;  %s3622_s0 = sld [smem:[#allocation32_spill]] }
  0x15   :  { %s145_s29 = sshll.u32 %s3380_s28, 4  ;;  %s3381_s18 = smov [#allocation2]   ;;  %s146_s29 = int_to_ptr.vmem [resolvable:$true] %s145_s29 }
  0x16   :  { %151 = dma.hbm_to_vmem [thread:$0]  %s144_s27, 8192, %s146_s29, [#allocation18], %s3378_s24, %s3378_s24, %s3379_s25  }
  0x17   :  { %s37_s1 = sshll.u32 %s3381_s18, 4  ;;  %s57_s20 = sshll.u32 %s3606_s2, 4  ;;  %s38_s1 = int_to_ptr.vmem [resolvable:$true] %s37_s1  ;;  %s58_s20 = int_to_ptr.hbm [resolvable:$true] %s57_s20 }
  0x18   :  { %s79_s3 = sshll.u32 %s3608_s4, 4  ;;  %s3382_s23 = smov [#allocation7]   ;;  %s80_s3 = int_to_ptr.hbm [resolvable:$true] %s79_s3 }
  0x19   :  { %s59_s26 = sshll.u32 %s3382_s23, 4  ;;  %s3383_s24 = smov [#allocation10]   ;;  %s60_s26 = int_to_ptr.vmem [resolvable:$true] %s59_s26 }
  0x1a   :  { %s35_s17 = sshll.u32 %s3622_s0, 4  ;;  %s81_s25 = sshll.u32 %s3383_s24, 4  ;;  %s36_s17 = int_to_ptr.hbm [resolvable:$true] %s35_s17  ;;  %s82_s25 = int_to_ptr.vmem [resolvable:$true] %s81_s25 }
  0x1b   :  { %40 = dma.hbm_to_vmem [thread:$0]  %s36_s17, 256, %s38_s1, [#allocation3]  }
  0x1c   :  { %62 = dma.hbm_to_vmem [thread:$0]  %s58_s20, 64, %s60_s26, [#allocation6]  }
  0x1d   :  { %s101_s28 = sshll.u32 %s3610_s6, 4  ;;  %s128_s8 = sshll.u32 %s3614_s10, 4  ;;  %s102_s28 = int_to_ptr.hbm [resolvable:$true] %s101_s28  ;;  %s129_s8 = int_to_ptr.hbm [resolvable:$true] %s128_s8 }
  0x1e   :  { %84 = dma.hbm_to_vmem [thread:$0]  %s80_s3, 256, %s82_s25, [#allocation9]  }
  0x1f   :  { %s3384_s30 = smov [#allocation13]   ;;  %s3385_s0 = smov [#allocation16]  }
  0x20   :  { %s103_s4 = sshll.u32 %s3384_s30, 4  ;;  %s130_s17 = sshll.u32 %s3385_s0, 4  ;;  %s104_s4 = int_to_ptr.vmem [resolvable:$true] %s103_s4  ;;  %s131_s17 = int_to_ptr.vmem [resolvable:$true] %s130_s17 }
  0x21   :  { %106 = dma.hbm_to_vmem [thread:$0]  %s102_s28, 256, %s104_s4, [#allocation12]  }
  0x22   :  { %s3386_s18 = smov 128   ;;  %s3387_s1 = smov 8  }
  0x23   :  { %136 = dma.hbm_to_vmem [thread:$0]  %s129_s8, 4096, %s131_s17, [#allocation15], %s3386_s18, %s3386_s18, %s3387_s1  }
  0x24   :  { %s156_s21 = sshll.u32 %s3617_s13, 4  ;;  %s3388_s10 = smov [#allocation19]   ;;  %s157_s21 = int_to_ptr.hbm [resolvable:$true] %s156_s21 }
  0x25   :  { %s158_s20 = sshll.u32 %s3388_s10, 4  ;;  %s159_s20 = int_to_ptr.vmem [resolvable:$true] %s158_s20 }
  0x26   :  { %164 = dma.hbm_to_vmem [thread:$0]  %s157_s21, 4096, %s159_s20, [#allocation18], %s3386_s18, %s3386_s18, %s3387_s1  }
  0x27   :  { %3358 = dma.done.wait [#allocation3], 256  }
  0x28   :  { %3359 = vsyncadd [#allocation3], 4294967040 }
  0x29   :  { %3360 = dma.done.wait [#allocation6], 192  }
  0x2a   :  { %3361 = vsyncadd [#allocation6], 4294967104 }
  0x2b   :  { %3362 = dma.done.wait [#allocation9], 320  }
  0x2c   :  { %3363 = vsyncadd [#allocation9], 4294966976 }
  0x2d   :  { %3364 = dma.done.wait [#allocation12], 512  }
  0x2e   :  { %3365 = vsyncadd [#allocation12], 4294966784 }
  0x2f   :  { %3366 = dma.done.wait [#allocation15], 12288  }
  0x30   :  { %3367 = vsyncadd [#allocation15], 4294955008 }
  0x31   :  { %3368 = dma.done.wait [#allocation18], 12288  }
  0x32   :  { %3369 = vsyncadd [#allocation18], 4294955008  ;;  %v3519_v0 = vld [vmem:[#allocation2] sm:$0xff]  ;;  %v3521_v1 = vld [vmem:[#allocation2 + $0x8] sm:$0xff]  ;;  %v3389_v60 = vmov 256.0   ;;  %s3390_s3 = smov 127  }
  0x33   :  { %v2127_v2 = vld [vmem:[#allocation14 + $0xe0] sm:$0xf]  ;;  %v213_v3 = vmul.f32 %v3519_v0, %v3519_v0  ;;  %v214_v4 = vmul.f32 %v3521_v1, %v3521_v1  ;;  %v2815_v5 = vld [vmem:[#allocation14 + $0xec] sm:$0xf0]  ;;  %v2813_v10 = vld [vmem:[#allocation14 + $0xe4] sm:$0xf]  ;;  %2998 = vrcp.f32 %v3389_v60 }
  0x34   :  { %v2255_v6 = vld [vmem:[#allocation14 + $0x1e0] sm:$0xf]  ;;  %v2847_v7 = vld [vmem:[#allocation14 + $0x1ec] sm:$0xf0]  ;;  %v2128_v8 = vor.u32 %v2815_v5, %v2127_v2  ;;  %v2129_v11 = vld [vmem:[#allocation14 + $0xf0] sm:$0xf0] }
  0x35   :  { %v2256_v9 = vor.u32 %v2847_v7, %v2255_v6  ;;  %v2845_v12 = vld [vmem:[#allocation14 + $0x1e4] sm:$0xf]  ;;  %v215_v13 = vadd.f32 %v214_v4, %v213_v3  ;;  %v2132_v14 = vor.u32 %v2813_v10, %v2129_v11  ;;  %v2257_v15 = vld [vmem:[#allocation14 + $0x1f0] sm:$0xf0]  ;;  %v2111_v16 = vld [vmem:[#allocation14 + $0xc0] sm:$0xf] }
  0x36   :  { %v2811_v17 = vld [vmem:[#allocation14 + $0xcc] sm:$0xf0]  ;;  %642 = vmatpush.bf16.msra.mxu0 %v2128_v8  ;;  %v2260_v18 = vor.u32 %v2845_v12, %v2257_v15  ;;  %v2239_v20 = vld [vmem:[#allocation14 + $0x1c0] sm:$0xf]  ;;  %v2809_v22 = vld [vmem:[#allocation14 + $0xc4] sm:$0xf] }
  0x37   :  { %655 = vmatpush.bf16.msra.mxu1 %v2256_v9  ;;  %v2112_v19 = vor.u32 %v2811_v17, %v2111_v16  ;;  %v2843_v21 = vld [vmem:[#allocation14 + $0x1cc] sm:$0xf0]  ;;  %216 = vadd.xlane.f32.xlu0 %v215_v13  ;;  %v2113_v24 = vld [vmem:[#allocation14 + $0xd0] sm:$0xf0]  ;;  %v2841_v25 = vld [vmem:[#allocation14 + $0x1c4] sm:$0xf] }
  0x38   :  { %668 = vmatpush.bf16.msra.mxu2 %v2132_v14  ;;  %v2240_v23 = vor.u32 %v2843_v21, %v2239_v20  ;;  %v2241_v26 = vld [vmem:[#allocation14 + $0x1d0] sm:$0xf0]  ;;  %681 = vmatpush.bf16.msra.mxu3 %v2260_v18  ;;  %v2116_v27 = vor.u32 %v2809_v22, %v2113_v24  ;;  %v2095_v29 = vld [vmem:[#allocation14 + $0xa0] sm:$0xf]  ;;  %v2807_v30 = vld [vmem:[#allocation14 + $0xac] sm:$0xf0] }
  0x39   :  { %v2244_v28 = vor.u32 %v2841_v25, %v2241_v26  ;;  %v2223_v31 = vld [vmem:[#allocation14 + $0x1a0] sm:$0xf]  ;;  %v2839_v32 = vld [vmem:[#allocation14 + $0x1ac] sm:$0xf0]  ;;  %v2805_v33 = vld [vmem:[#allocation14 + $0xa4] sm:$0xf]  ;;  %v2096_v35 = vor.u32 %v2807_v30, %v2095_v29  ;;  %v3527_v16 = vpop.eup %2998 }
  0x3a   :  { %v2097_v34 = vld [vmem:[#allocation14 + $0xb0] sm:$0xf0]  ;;  %643 = vmatpush.bf16.msra.mxu0 %v2112_v19  ;;  %v2224_v36 = vor.u32 %v2839_v32, %v2223_v31  ;;  %v2837_v37 = vld [vmem:[#allocation14 + $0x1a4] sm:$0xf]  ;;  %v2079_v39 = vld [vmem:[#allocation14 + $0x80] sm:$0xf]  ;;  %vm223_vm0 = vweird.f32 %v3527_v16 }
  0x3b   :  { %656 = vmatpush.bf16.msra.mxu1 %v2240_v23  ;;  %v2225_v38 = vld [vmem:[#allocation14 + $0x1b0] sm:$0xf0]  ;;  %v2100_v40 = vor.u32 %v2805_v33, %v2097_v34  ;;  %v2803_v41 = vld [vmem:[#allocation14 + $0x8c] sm:$0xf0]  ;;  %v2207_v42 = vld [vmem:[#allocation14 + $0x180] sm:$0xf] }
  0x3c   :  { %669 = vmatpush.bf16.msra.mxu2 %v2116_v27  ;;  %v2835_v43 = vld [vmem:[#allocation14 + $0x18c] sm:$0xf0]  ;;  %682 = vmatpush.bf16.msra.mxu3 %v2244_v28  ;;  %v2228_v44 = vor.u32 %v2837_v37, %v2225_v38  ;;  %v2801_v45 = vld [vmem:[#allocation14 + $0x84] sm:$0xf]  ;;  %v2081_v46 = vld [vmem:[#allocation14 + $0x90] sm:$0xf0]  ;;  %v2080_v49 = vor.u32 %v2803_v41, %v2079_v39 }
  0x3d   :  { %v2833_v47 = vld [vmem:[#allocation14 + $0x184] sm:$0xf]  ;;  %v2209_v48 = vld [vmem:[#allocation14 + $0x190] sm:$0xf0]  ;;  %v2208_v50 = vor.u32 %v2835_v43, %v2207_v42  ;;  %v2084_v51 = vor.u32 %v2801_v45, %v2081_v46  ;;  %v2063_v53 = vld [vmem:[#allocation14 + $0x60] sm:$0xf] }
  0x3e   :  { %644 = vmatpush.bf16.msra.mxu0 %v2096_v35  ;;  %v2212_v52 = vor.u32 %v2833_v47, %v2209_v48  ;;  %v2799_v54 = vld [vmem:[#allocation14 + $0x6c] sm:$0xf0]  ;;  %v2191_v55 = vld [vmem:[#allocation14 + $0x160] sm:$0xf]  ;;  %v2797_v58 = vld [vmem:[#allocation14 + $0x64] sm:$0xf] }
  0x3f   :  { %657 = vmatpush.bf16.msra.mxu1 %v2224_v36  ;;  %v2064_v56 = vor.u32 %v2799_v54, %v2063_v53  ;;  %v2831_v57 = vld [vmem:[#allocation14 + $0x16c] sm:$0xf0]  ;;  %v2065_v59 = vld [vmem:[#allocation14 + $0x70] sm:$0xf0]  ;;  %v2829_v63 = vld [vmem:[#allocation14 + $0x164] sm:$0xf] }
  0x40   :  { %670 = vmatpush.bf16.msra.mxu2 %v2100_v40  ;;  %683 = vmatpush.bf16.msra.mxu3 %v2228_v44  ;;  %v2192_v61 = vor.u32 %v2831_v57, %v2191_v55  ;;  %v2068_v62 = vor.u32 %v2797_v58, %v2065_v59  ;;  %v2193_v2 = vld [vmem:[#allocation14 + $0x170] sm:$0xf0]  ;;  %v2047_v4 = vld [vmem:[#allocation14 + $0x40] sm:$0xf]  ;;  %v2795_v5 = vld [vmem:[#allocation14 + $0x4c] sm:$0xf0] }
  0x41   :  { %v2196_v3 = vor.u32 %v2829_v63, %v2193_v2  ;;  %v2175_v6 = vld [vmem:[#allocation14 + $0x140] sm:$0xf]  ;;  %v2048_v7 = vor.u32 %v2795_v5, %v2047_v4  ;;  %v2827_v8 = vld [vmem:[#allocation14 + $0x14c] sm:$0xf0]  ;;  %v2793_v9 = vld [vmem:[#allocation14 + $0x44] sm:$0xf] }
  0x42   :  { %645 = vmatpush.bf16.msra.mxu0 %v2080_v49  ;;  %v2049_v10 = vld [vmem:[#allocation14 + $0x50] sm:$0xf0]  ;;  %v2176_v11 = vor.u32 %v2827_v8, %v2175_v6  ;;  %v2825_v13 = vld [vmem:[#allocation14 + $0x144] sm:$0xf]  ;;  %v2031_v17 = vld [vmem:[#allocation14 + $0x20] sm:$0xf] }
  0x43   :  { %658 = vmatpush.bf16.msra.mxu1 %v2208_v50  ;;  %v2052_v12 = vor.u32 %v2793_v9, %v2049_v10  ;;  %v2177_v14 = vld [vmem:[#allocation14 + $0x150] sm:$0xf0]  ;;  %v2791_v18 = vld [vmem:[#allocation14 + $0x2c] sm:$0xf0]  ;;  %v2159_v19 = vld [vmem:[#allocation14 + $0x120] sm:$0xf] }
  0x44   :  { %671 = vmatpush.bf16.msra.mxu2 %v2084_v51  ;;  %684 = vmatpush.bf16.msra.mxu3 %v2212_v52  ;;  %v2180_v15 = vor.u32 %v2825_v13, %v2177_v14  ;;  %v2032_v20 = vor.u32 %v2791_v18, %v2031_v17  ;;  %v2823_v21 = vld [vmem:[#allocation14 + $0x12c] sm:$0xf0]  ;;  %v2789_v22 = vld [vmem:[#allocation14 + $0x24] sm:$0xf]  ;;  %v2033_v23 = vld [vmem:[#allocation14 + $0x30] sm:$0xf0] }
  0x45   :  { %v2160_v24 = vor.u32 %v2823_v21, %v2159_v19  ;;  %v2036_v25 = vor.u32 %v2789_v22, %v2033_v23  ;;  %v2821_v26 = vld [vmem:[#allocation14 + $0x124] sm:$0xf]  ;;  %v2161_v27 = vld [vmem:[#allocation14 + $0x130] sm:$0xf0]  ;;  %v3530_v28 = vmul.f32 256.0, %v3527_v16  ;;  %vm791_vm4 = vcmask 1043456  }
  0x46   :  { %646 = vmatpush.bf16.msra.mxu0 %v2064_v56  ;;  %v2164_v29 = vor.u32 %v2821_v26, %v2161_v27  ;;  %v2015_v30 = vld [vmem:[#allocation14] sm:$0xf]  ;;  %v2787_v31 = vld [vmem:[#allocation14 + $0xc] sm:$0xf0]  ;;  %v2785_v35 = vld [vmem:[#allocation14 + $0x4] sm:$0xf] }
  0x47   :  { %659 = vmatpush.bf16.msra.mxu1 %v2192_v61  ;;  %v2143_v32 = vld [vmem:[#allocation14 + $0x100] sm:$0xf]  ;;  %v2016_v33 = vor.u32 %v2787_v31, %v2015_v30  ;;  %v2819_v34 = vld [vmem:[#allocation14 + $0x10c] sm:$0xf0]  ;;  %v2017_v36 = vld [vmem:[#allocation14 + $0x10] sm:$0xf0] }
  0x48   :  { %672 = vmatpush.bf16.msra.mxu2 %v2068_v62  ;;  %685 = vmatpush.bf16.msra.mxu3 %v2196_v3  ;;  %v2144_v37 = vor.u32 %v2819_v34, %v2143_v32  ;;  %v2020_v38 = vor.u32 %v2785_v35, %v2017_v36  ;;  %v2817_v39 = vld [vmem:[#allocation14 + $0x104] sm:$0xf]  ;;  %v2145_v40 = vld [vmem:[#allocation14 + $0x110] sm:$0xf0]  ;;  %v2135_v41 = vld [vmem:[#allocation14 + $0xe8] sm:$0xf] }
  0x49   :  { %v2148_v42 = vor.u32 %v2817_v39, %v2145_v40  ;;  %v2816_v43 = vld [vmem:[#allocation14 + $0xf4] sm:$0xf0]  ;;  %v2263_v44 = vld [vmem:[#allocation14 + $0x1e8] sm:$0xf]  ;;  %v2814_v48 = vld [vmem:[#allocation14 + $0xec] sm:$0xf] }
  0x4a   :  { %647 = vmatpush.bf16.msra.mxu0 %v2048_v7  ;;  %v2848_v45 = vld [vmem:[#allocation14 + $0x1f4] sm:$0xf0]  ;;  %v2136_v46 = vor.u32 %v2816_v43, %v2135_v41  ;;  %v2137_v49 = vld [vmem:[#allocation14 + $0xf8] sm:$0xf0]  ;;  %v2846_v50 = vld [vmem:[#allocation14 + $0x1ec] sm:$0xf] }
  0x4b   :  { %660 = vmatpush.bf16.msra.mxu1 %v2176_v11  ;;  %v2264_v47 = vor.u32 %v2848_v45, %v2263_v44  ;;  %v2140_v51 = vor.u32 %v2814_v48, %v2137_v49  ;;  %v2265_v52 = vld [vmem:[#allocation14 + $0x1f8] sm:$0xf0]  ;;  %v2119_v53 = vld [vmem:[#allocation14 + $0xc8] sm:$0xf]  ;;  %v2812_v54 = vld [vmem:[#allocation14 + $0xd4] sm:$0xf0] }
  0x4c   :  { %673 = vmatpush.bf16.msra.mxu2 %v2052_v12  ;;  %686 = vmatpush.bf16.msra.mxu3 %v2180_v15  ;;  %v2268_v55 = vor.u32 %v2846_v50, %v2265_v52  ;;  %v2120_v56 = vor.u32 %v2812_v54, %v2119_v53  ;;  %v2247_v57 = vld [vmem:[#allocation14 + $0x1c8] sm:$0xf]  ;;  %v2844_v58 = vld [vmem:[#allocation14 + $0x1d4] sm:$0xf0]  ;;  %v2810_v59 = vld [vmem:[#allocation14 + $0xcc] sm:$0xf] }
  0x4d   :  { %v2248_v60 = vor.u32 %v2844_v58, %v2247_v57  ;;  %v2121_v61 = vld [vmem:[#allocation14 + $0xd8] sm:$0xf0]  ;;  %v2842_v62 = vld [vmem:[#allocation14 + $0x1cc] sm:$0xf]  ;;  %v220_v2 = vsub.f32 1.0, %v3530_v28  ;;  %vm837_vm5 = vcmask 1045504  }
  0x4e   :  { %648 = vmatpush.bf16.msra.mxu0 %v2032_v20  ;;  %v2249_v63 = vld [vmem:[#allocation14 + $0x1d8] sm:$0xf0]  ;;  %v2124_v3 = vor.u32 %v2810_v59, %v2121_v61  ;;  %v2103_v5 = vld [vmem:[#allocation14 + $0xa8] sm:$0xf]  ;;  %v2808_v6 = vld [vmem:[#allocation14 + $0xb4] sm:$0xf0] }
  0x4f   :  { %661 = vmatpush.bf16.msra.mxu1 %v2160_v24  ;;  %v2252_v4 = vor.u32 %v2842_v62, %v2249_v63  ;;  %v2231_v7 = vld [vmem:[#allocation14 + $0x1a8] sm:$0xf]  ;;  %v2104_v8 = vor.u32 %v2808_v6, %v2103_v5  ;;  %v2840_v9 = vld [vmem:[#allocation14 + $0x1b4] sm:$0xf0]  ;;  %v2806_v10 = vld [vmem:[#allocation14 + $0xac] sm:$0xf]  ;;  %v221_v17 = vmul.f32 %v3527_v16, %v220_v2 }
  0x50   :  { %674 = vmatpush.bf16.msra.mxu2 %v2036_v25  ;;  %687 = vmatpush.bf16.msra.mxu3 %v2164_v29  ;;  %v2105_v11 = vld [vmem:[#allocation14 + $0xb8] sm:$0xf0]  ;;  %v2232_v12 = vor.u32 %v2840_v9, %v2231_v7  ;;  %v2838_v14 = vld [vmem:[#allocation14 + $0x1ac] sm:$0xf]  ;;  %v2087_v19 = vld [vmem:[#allocation14 + $0x88] sm:$0xf] }
  0x51   :  { %v2108_v13 = vor.u32 %v2806_v10, %v2105_v11  ;;  %v2233_v15 = vld [vmem:[#allocation14 + $0x1b8] sm:$0xf0]  ;;  %v2804_v20 = vld [vmem:[#allocation14 + $0x94] sm:$0xf0]  ;;  %v2215_v21 = vld [vmem:[#allocation14 + $0x188] sm:$0xf]  ;;  %v222_v30 = vadd.f32 %v3527_v16, %v221_v17 }
  0x52   :  { %649 = vmatpush.bf16.msra.mxu0 %v2016_v33  ;;  %v2236_v18 = vor.u32 %v2838_v14, %v2233_v15  ;;  %v2088_v22 = vor.u32 %v2804_v20, %v2087_v19  ;;  %v2836_v23 = vld [vmem:[#allocation14 + $0x194] sm:$0xf0]  ;;  %v2802_v24 = vld [vmem:[#allocation14 + $0x8c] sm:$0xf]  ;;  %v2089_v25 = vld [vmem:[#allocation14 + $0x98] sm:$0xf0] }
  0x53   :  { %662 = vmatpush.bf16.msra.mxu1 %v2144_v37  ;;  %v2216_v26 = vor.u32 %v2836_v23, %v2215_v21  ;;  %v2092_v27 = vor.u32 %v2802_v24, %v2089_v25  ;;  %v2834_v28 = vld [vmem:[#allocation14 + $0x18c] sm:$0xf]  ;;  %v2217_v29 = vld [vmem:[#allocation14 + $0x198] sm:$0xf0]  ;;  %v2071_v32 = vld [vmem:[#allocation14 + $0x68] sm:$0xf]  ;;  %v3537_v39 = vsel %vm223_vm0, %v3527_v16, %v222_v30 }
  0x54   :  { %675 = vmatpush.bf16.msra.mxu2 %v2020_v38  ;;  %688 = vmatpush.bf16.msra.mxu3 %v2148_v42  ;;  %v2220_v31 = vor.u32 %v2834_v28, %v2217_v29  ;;  %v2800_v33 = vld [vmem:[#allocation14 + $0x74] sm:$0xf0]  ;;  %v2199_v34 = vld [vmem:[#allocation14 + $0x168] sm:$0xf]  ;;  %v2798_v37 = vld [vmem:[#allocation14 + $0x6c] sm:$0xf] }
  0x55   :  { %v2072_v35 = vor.u32 %v2800_v33, %v2071_v32  ;;  %v2832_v36 = vld [vmem:[#allocation14 + $0x174] sm:$0xf0]  ;;  %v2073_v38 = vld [vmem:[#allocation14 + $0x78] sm:$0xf0]  ;;  %v2830_v42 = vld [vmem:[#allocation14 + $0x16c] sm:$0xf] }
  0x56   :  { %694 = vmatpush.bf16.msrb.mxu0 %v2136_v46  ;;  %v2200_v40 = vor.u32 %v2832_v36, %v2199_v34  ;;  %v2076_v41 = vor.u32 %v2798_v37, %v2073_v38  ;;  %v2201_v43 = vld [vmem:[#allocation14 + $0x178] sm:$0xf0]  ;;  %v2055_v44 = vld [vmem:[#allocation14 + $0x48] sm:$0xf]  ;;  %v2796_v46 = vld [vmem:[#allocation14 + $0x54] sm:$0xf0] }
  0x57   :  { %707 = vmatpush.bf16.msrb.mxu1 %v2264_v47  ;;  %v2204_v45 = vor.u32 %v2830_v42, %v2201_v43  ;;  %v2183_v47 = vld [vmem:[#allocation14 + $0x148] sm:$0xf]  ;;  %v2828_v48 = vld [vmem:[#allocation14 + $0x154] sm:$0xf0]  ;;  %v2056_v50 = vor.u32 %v2796_v46, %v2055_v44  ;;  %v2794_v52 = vld [vmem:[#allocation14 + $0x4c] sm:$0xf] }
  0x58   :  { %720 = vmatpush.bf16.msrb.mxu2 %v2140_v51  ;;  %733 = vmatpush.bf16.msrb.mxu3 %v2268_v55  ;;  %v2184_v51 = vor.u32 %v2828_v48, %v2183_v47  ;;  %v2057_v53 = vld [vmem:[#allocation14 + $0x58] sm:$0xf0]  ;;  %v2826_v54 = vld [vmem:[#allocation14 + $0x14c] sm:$0xf]  ;;  %v2039_v57 = vld [vmem:[#allocation14 + $0x28] sm:$0xf] }
  0x59   :  { %v2060_v55 = vor.u32 %v2794_v52, %v2057_v53  ;;  %v2792_v58 = vld [vmem:[#allocation14 + $0x34] sm:$0xf0]  ;;  %v2790_v62 = vld [vmem:[#allocation14 + $0x2c] sm:$0xf]  ;;  %v2041_v2 = vld [vmem:[#allocation14 + $0x38] sm:$0xf0] }
  0x5a   :  { %695 = vmatpush.bf16.msrb.mxu0 %v2120_v56  ;;  %v2185_v56 = vld [vmem:[#allocation14 + $0x158] sm:$0xf0]  ;;  %v2824_v61 = vld [vmem:[#allocation14 + $0x134] sm:$0xf0]  ;;  %v2023_v7 = vld [vmem:[#allocation14 + $0x8] sm:$0xf] }
  0x5b   :  { %708 = vmatpush.bf16.msrb.mxu1 %v2248_v60  ;;  %v2188_v59 = vor.u32 %v2826_v54, %v2185_v56  ;;  %v2167_v60 = vld [vmem:[#allocation14 + $0x128] sm:$0xf]  ;;  %v2169_v6 = vld [vmem:[#allocation14 + $0x138] sm:$0xf0]  ;;  %v2788_v9 = vld [vmem:[#allocation14 + $0x14] sm:$0xf0] }
  0x5c   :  { %721 = vmatpush.bf16.msrb.mxu2 %v2124_v3  ;;  %734 = vmatpush.bf16.msrb.mxu3 %v2252_v4  ;;  %v2822_v3 = vld [vmem:[#allocation14 + $0x12c] sm:$0xf]  ;;  %v2040_v4 = vor.u32 %v2792_v58, %v2039_v57  ;;  %v2168_v5 = vor.u32 %v2824_v61, %v2167_v60  ;;  %v2151_v10 = vld [vmem:[#allocation14 + $0x108] sm:$0xf]  ;;  %v2820_v11 = vld [vmem:[#allocation14 + $0x114] sm:$0xf0] }
  0x5d   :  { %v2025_v14 = vld [vmem:[#allocation14 + $0x18] sm:$0xf0]  ;;  %v2818_v15 = vld [vmem:[#allocation14 + $0x10c] sm:$0xf]  ;;  %v2152_v19 = vor.u32 %v2820_v11, %v2151_v10  ;;  %v312_v38 = vld [vmem:[%s3613_s9] sm:$0xf] }
  0x5e   :  { %696 = vmatpush.bf16.msrb.mxu0 %v2104_v8  ;;  %v2044_v8 = vor.u32 %v2790_v62, %v2041_v2  ;;  %v2153_v17 = vld [vmem:[#allocation14 + $0x118] sm:$0xf0]  ;;  %v315_v43 = vperm.slane %v312_v38, 1  ;;  %s3391_s9 = smov 1   ;;  %v317_v56 = vperm.slane %v312_v38, 3  ;;  %vm821_vm8 = vcmask 97280  }
  0x5f   :  { %709 = vmatpush.bf16.msrb.mxu1 %v2232_v12  ;;  %v2172_v12 = vor.u32 %v2822_v3, %v2169_v6  ;;  %v2156_v21 = vor.u32 %v2818_v15, %v2153_v17  ;;  %v750_v15 = vld [vmem:[#allocation13] sm:$0xff]  ;;  %s1973_s27 = sshll.u32 %s3619_s15, 4  ;;  %s3393_s28 = smov [#allocation23]   ;;  %s1974_s27 = int_to_ptr.hbm [resolvable:$true] %s1973_s27 }
  0x60   :  { %722 = vmatpush.bf16.msrb.mxu2 %v2108_v13  ;;  %735 = vmatpush.bf16.msrb.mxu3 %v2236_v18  ;;  %v2786_v13 = vld [vmem:[#allocation14 + $0xc] sm:$0xf]  ;;  %v2024_v18 = vor.u32 %v2788_v9, %v2023_v7  ;;  %s1984_s2 = sshll.u32 %s3393_s28, 4  ;;  %s1986_s30 = sshll.u32 %s3620_s16, 4  ;;  %s1985_s2 = int_to_ptr.vmem [resolvable:$true] %s1984_s2  ;;  %s1987_s30 = int_to_ptr.hbm [resolvable:$true] %s1986_s30 }
  0x61   :  { %v2028_v20 = vor.u32 %v2786_v13, %v2025_v14  ;;  %v748_v13 = vld [vmem:[#allocation11] sm:$0xff]  ;;  %s3394_s15 = smov [#allocation20]   ;;  %s1963_s16 = sshll.u32 %s3618_s14, 4  ;;  %s1964_s16 = int_to_ptr.hbm [resolvable:$true] %s1963_s16 }
  0x62   :  { %697 = vmatpush.bf16.msrb.mxu0 %v2088_v22  ;;  %s1961_s4 = sshll.u32 %s3394_s15, 4  ;;  %s1962_s4 = int_to_ptr.vmem [resolvable:$true] %s1961_s4 }
  0x63   :  { %710 = vmatpush.bf16.msrb.mxu1 %v2216_v26 }
  0x64   :  { %723 = vmatpush.bf16.msrb.mxu2 %v2092_v27  ;;  %736 = vmatpush.bf16.msrb.mxu3 %v2220_v31  ;;  %v212_v27 = vld [vmem:[%s3611_s7] sm:$0x3] }
  0x65   :  { %v240_v29 = vperm.slane %v212_v27, 0  ;;  %v241_v30 = vperm.slane %v212_v27, 1 }
  0x66   :  { %698 = vmatpush.bf16.msrb.mxu0 %v2072_v35 }
  0x67   :  { %711 = vmatpush.bf16.msrb.mxu1 %v2200_v40  ;;  %v314_v40 = vperm.slane %v312_v38, 0 }
  0x68   :  { %724 = vmatpush.bf16.msrb.mxu2 %v2076_v41  ;;  %737 = vmatpush.bf16.msrb.mxu3 %v2204_v45 }
  0x6a   :  { %699 = vmatpush.bf16.msrb.mxu0 %v2056_v50  ;;  %v316_v50 = vperm.slane %v312_v38, 2 }
  0x6b   :  { %712 = vmatpush.bf16.msrb.mxu1 %v2184_v51 }
  0x6c   :  { %725 = vmatpush.bf16.msrb.mxu2 %v2060_v55  ;;  %738 = vmatpush.bf16.msrb.mxu3 %v2188_v59 }
  0x6e   :  { %700 = vmatpush.bf16.msrb.mxu0 %v2040_v4 }
  0x6f   :  { %713 = vmatpush.bf16.msrb.mxu1 %v2168_v5 }
  0x70   :  { %726 = vmatpush.bf16.msrb.mxu2 %v2044_v8  ;;  %739 = vmatpush.bf16.msrb.mxu3 %v2172_v12  ;;  %v758_v8 = vlaneseq  ;;  %v746_v12 = vld [vmem:[#allocation10] sm:$0xff] }
  0x72   :  { %701 = vmatpush.bf16.msrb.mxu0 %v2024_v18  ;;  %v759_v10 = vand.u32 127, %v758_v8  ;;  %v2863_v8 = vld [vmem:[#allocation16 + $0x74] sm:$0xf] }
  0x73   :  { %714 = vmatpush.bf16.msrb.mxu1 %v2152_v19 }
  0x74   :  { %727 = vmatpush.bf16.msrb.mxu2 %v2028_v20  ;;  %740 = vmatpush.bf16.msrb.mxu3 %v2156_v21  ;;  %vm760_vm6 = vcmp.lt.s32.totalorder %v759_v10, 127  ;;  %v749_v20 = vld [vmem:[#allocation11 + $0x8] sm:$0xff]  ;;  %vm771_vm7 = vcmp.lt.s32.totalorder %v759_v10, 1  ;;  %v2331_v10 = vld [vmem:[#allocation16 + $0x78] sm:$0xf0] }
  0xaa   :  { %v217_v49 = vpop.xlane.xlu0 %216 }
  0xab   :  { %v225_v16 = vmul.f32 %v3537_v39, %v217_v49 }
  0xad   :  { %v226_v63 = vadd.f32 1e-05, %v225_v16 }
  0xaf   :  { %3000 = vrsqrt.f32 %v226_v63  ;;  %vm233_vm2 = vweird.f32 %v226_v63 }
  0xb5   :  { %v3001_v22 = vpop.eup %3000 }
  0xb6   :  { %v228_v23 = vmul.f32 %v3001_v22, %v226_v63  ;;  %vm234_vm1 = vweird.f32 %v3001_v22  ;;  %v793_v63 = vld [vmem:[#allocation8] sm:$0xf] }
  0xb7   :  { %vm235_vm3 = vmor %vm233_vm2, %vm234_vm1 }
  0xb8   :  { %v229_v24 = vmul.f32 %v3001_v22, %v228_v23 }
  0xba   :  { %v230_v25 = vmul.f32 0.5, %v229_v24 }
  0xbc   :  { %v231_v26 = vsub.f32 1.5, %v230_v25  ;;  %v747_v25 = vld [vmem:[#allocation10 + $0x8] sm:$0xff] }
  0xbe   :  { %v232_v28 = vmul.f32 %v3001_v22, %v231_v26 }
  0xc0   :  { %v236_v31 = vsel %vm235_vm3, %v3001_v22, %v232_v28 }
  0xc1   :  { %v237_v32 = vmul.f32 %v236_v31, %v3519_v0  ;;  %v238_v33 = vmul.f32 %v236_v31, %v3521_v1 }
  0xc3   :  { %v244_v34 = vmul.f32 %v240_v29, %v237_v32  ;;  %v245_v35 = vmul.f32 %v241_v30, %v238_v33  ;;  %v787_v29 = vld [vmem:[#allocation7] sm:$0xf]  ;;  %v751_v32 = vld [vmem:[#allocation13 + $0x8] sm:$0xff] }
  0xc5   :  { %v246_v36 = vpack.c.bf16 %v244_v34, %v244_v34  ;;  %v247_v37 = vpack.c.bf16 %v245_v35, %v245_v35 }
  0xc7   :  { %650 = vmatmul.bf16.vlgmr.msra.gmra.mxu0 %v246_v36  ;;  %663 = vmatmul.bf16.vlgmr.msra.gmra.mxu1 %v247_v37 }
  0xc8   :  { %676 = vmatmul.bf16.vlgmr.msra.gmra.mxu2 %v246_v36  ;;  %689 = vmatmul.bf16.vlgmr.msra.gmra.mxu3 %v247_v37 }
  0xd7   :  { %702 = vmatmul.bf16.vlgmr.msrb.gmra.mxu0 %v246_v36  ;;  %715 = vmatmul.bf16.vlgmr.msrb.gmra.mxu1 %v247_v37 }
  0xd8   :  { %728 = vmatmul.bf16.vlgmr.msrb.gmra.mxu2 %v246_v36  ;;  %741 = vmatmul.bf16.vlgmr.msrb.gmra.mxu3 %v247_v37 }
 0x144   :  { %v651_v0 = vpop.f32.mrf.mxu0  ;;  %v664_v41 = vpop.f32.mrf.mxu1 }
 0x145   :  { %v652_v1 = vadd.f32 %v651_v0, %v314_v40 }
 0x147   :  { %v3548_v42 = vadd.f32 %v664_v41, %v652_v1 }
 0x149   :  { %754 = vrot.lane.b32.xlu1 %v3548_v42, %s3390_s3  ;;  %v752_v33 = vmul.f32 %v746_v12, %v3548_v42 }
 0x14b   :  { %v677_v44 = vpop.f32.mrf.mxu2  ;;  %v690_v45 = vpop.f32.mrf.mxu3 }
 0x14c   :  { %v678_v46 = vadd.f32 %v677_v44, %v315_v43  ;;  %v653_v47 = vpop.f32.mrf.mxu0  ;;  %v666_v48 = vpop.f32.mrf.mxu1 }
 0x14e   :  { %v691_v49 = vadd.f32 %v690_v45, %v678_v46 }
 0x150   :  { %756 = vrot.lane.b32.xlu2 %v691_v49, %s3390_s3  ;;  %v753_v30 = vmul.f32 %v747_v25, %v691_v49 }
 0x153   :  { %v679_v51 = vpop.f32.mrf.mxu2  ;;  %v692_v52 = vpop.f32.mrf.mxu3 }
 0x154   :  { %v703_v53 = vpop.f32.mrf.mxu0  ;;  %v716_v54 = vpop.f32.mrf.mxu1 }
 0x155   :  { %v704_v16 = vadd.f32 %v703_v53, %v316_v50  ;;  %v802_v50 = vld [vmem:[#allocation5] sm:$0xff] }
 0x157   :  { %v717_v55 = vadd.f32 %v716_v54, %v704_v16 }
 0x158   :  { %767 = vrot.lane.b32.xlu2 %v3548_v42, %s3391_s9 }
 0x159   :  { %779 = vrot.lane.b32.xlu0 %v717_v55, %s3390_s3  ;;  %783 = vrot.lane.b32.xlu1 %v717_v55, %s3391_s9  ;;  %v778_v18 = vmul.f32 %v746_v12, %v717_v55  ;;  %v2862_v12 = vld [vmem:[#allocation16 + $0x64] sm:$0xf0] }
 0x15b   :  { %v729_v57 = vpop.f32.mrf.mxu2  ;;  %v742_v58 = vpop.f32.mrf.mxu3 }
 0x15c   :  { %v730_v59 = vadd.f32 %v729_v57, %v317_v56  ;;  %v705_v60 = vpop.f32.mrf.mxu0  ;;  %v718_v61 = vpop.f32.mrf.mxu1 }
 0x15e   :  { %v743_v62 = vadd.f32 %v742_v58, %v730_v59 }
 0x160   :  { %v795_v2 = vrot.slane %v743_v62, 4 }
 0x161   :  { %769 = vrot.lane.b32.xlu1 %v691_v49, %s3391_s9 }
 0x162   :  { %v797_v3 = vsel %vm791_vm4, %v793_v63, %v795_v2  ;;  %801 = vst [vmem:[#allocation23 + $0x8] sm:$0xf] %v795_v2 }
 0x163   :  { %800 = vst [vmem:[#allocation23] sm:$0xff] %v797_v3  ;;  %v731_v4 = vpop.f32.mrf.mxu2  ;;  %v744_v5 = vpop.f32.mrf.mxu3  ;;  %v807_v6 = vpack.c.bf16 %v795_v2, %v797_v3 }
 0x165   :  { %v839_v7 = vsel %vm837_vm5, %v807_v6, 0  ;;  %v2329_v6 = vld [vmem:[#allocation16 + $0x70] sm:$0xf] }
 0x166   :  { %848 = vmatpush.bf16.msra.mxu1 %v839_v7  ;;  %893 = vmatpush.bf16.msra.mxu3 %v839_v7  ;;  %v2864_v7 = vld [vmem:[#allocation16 + $0x74] sm:$0xf0] }
 0x1aa   :  { %v757_v11 = vpop.permute.xlu2 %756 }
 0x1b2   :  { %v768_v34 = vpop.permute.xlu2 %767 }
 0x1bb   :  { %v755_v9 = vpop.permute.xlu1 %754 }
 0x1bc   :  { %v762_v21 = vsel %vm760_vm6, %v757_v11, %v755_v9  ;;  %v761_v22 = vsel %vm760_vm6, %v755_v9, %v757_v11  ;;  %v2330_v9 = vor.u32 %v2864_v7, %v2329_v6  ;;  %v2321_v11 = vld [vmem:[#allocation16 + $0x60] sm:$0xf] }
 0x1bd   :  { %v764_v26 = vmul.f32 %v762_v21, %v749_v20  ;;  %v763_v28 = vmul.f32 %v761_v22, %v748_v13  ;;  %v2860_v20 = vld [vmem:[#allocation16 + $0x54] sm:$0xf0]  ;;  %v2859_v21 = vld [vmem:[#allocation16 + $0x54] sm:$0xf]  ;;  %v2315_v22 = vld [vmem:[#allocation16 + $0x58] sm:$0xf0] }
 0x1bf   :  { %v766_v36 = vadd.f32 %v764_v26, %v753_v30  ;;  %v765_v0 = vadd.f32 %v763_v28, %v752_v33  ;;  %v2879_v26 = vld [vmem:[#allocation16 + $0xf4] sm:$0xf]  ;;  %v2858_v30 = vld [vmem:[#allocation16 + $0x44] sm:$0xf0]  ;;  %v2385_v33 = vld [vmem:[#allocation16 + $0xe0] sm:$0xf] }
 0x1cb   :  { %v780_v14 = vpop.permute.xlu0 %779  ;;  %v784_v17 = vpop.permute.xlu1 %783 }
 0x1cc   :  { %v781_v19 = vmul.f32 %v780_v14, %v748_v13  ;;  %v785_v24 = vmul.f32 %v784_v17, %v750_v15  ;;  %v2334_v13 = vor.u32 %v2863_v8, %v2331_v10  ;;  %v2861_v14 = vld [vmem:[#allocation16 + $0x64] sm:$0xf]  ;;  %v2322_v17 = vor.u32 %v2862_v12, %v2321_v11  ;;  %v2852_v10 = vld [vmem:[#allocation16 + $0x14] sm:$0xf0]  ;;  %v2851_v12 = vld [vmem:[#allocation16 + $0x14] sm:$0xf] }
 0x1ce   :  { %v782_v23 = vadd.f32 %v781_v19, %v778_v18  ;;  %v2313_v19 = vld [vmem:[#allocation16 + $0x50] sm:$0xf] }
 0x1cf   :  { %v2314_v28 = vor.u32 %v2860_v20, %v2313_v19  ;;  %v2273_v19 = vld [vmem:[#allocation16] sm:$0xf]  ;;  %v2850_v20 = vld [vmem:[#allocation16 + $0x4] sm:$0xf0] }
 0x1d0   :  { %v786_v27 = vadd.f32 %v785_v24, %v782_v23  ;;  %v2393_v23 = vld [vmem:[#allocation16 + $0xf0] sm:$0xf]  ;;  %v2880_v24 = vld [vmem:[#allocation16 + $0xf4] sm:$0xf0] }
 0x1d1   :  { %v2394_v25 = vor.u32 %v2880_v24, %v2393_v23  ;;  %v2275_v23 = vld [vmem:[#allocation16 + $0x8] sm:$0xf0] }
 0x1d2   :  { %v789_v31 = vrot.slane %v786_v27, 4  ;;  %v2395_v27 = vld [vmem:[#allocation16 + $0xf8] sm:$0xf0] }
 0x1d3   :  { %v770_v35 = vpop.permute.xlu1 %769  ;;  %1106 = vmatpush.bf16.msrb.mxu1 %v2394_v25  ;;  %v2361_v25 = vld [vmem:[#allocation16 + $0xb0] sm:$0xf] }
 0x1d4   :  { %v792_v37 = vsel %vm791_vm4, %v787_v29, %v789_v31  ;;  %799 = vst [vmem:[#allocation21 + $0x8] sm:$0xf] %v789_v31  ;;  %v772_v38 = vsel %vm771_vm7, %v768_v34, %v770_v35  ;;  %v773_v40 = vsel %vm771_vm7, %v770_v35, %v768_v34  ;;  %v2305_v29 = vld [vmem:[#allocation16 + $0x40] sm:$0xf]  ;;  %v2878_v34 = vld [vmem:[#allocation16 + $0xe4] sm:$0xf0] }
 0x1d5   :  { %798 = vst [vmem:[#allocation21] sm:$0xff] %v792_v37  ;;  %v774_v41 = vmul.f32 %v773_v40, %v750_v15  ;;  %v775_v1 = vmul.f32 %v772_v38, %v751_v32  ;;  %v806_v43 = vpack.c.bf16 %v789_v31, %v792_v37  ;;  %v2323_v15 = vld [vmem:[#allocation16 + $0x68] sm:$0xf0]  ;;  %v2398_v31 = vor.u32 %v2879_v26, %v2395_v27  ;;  %v2877_v35 = vld [vmem:[#allocation16 + $0xe4] sm:$0xf] }
 0x1d6   :  { %v2326_v18 = vor.u32 %v2861_v14, %v2323_v15  ;;  %v2318_v32 = vor.u32 %v2859_v21, %v2315_v22  ;;  %v2307_v37 = vld [vmem:[#allocation16 + $0x48] sm:$0xf0]  ;;  %v2386_v38 = vor.u32 %v2878_v34, %v2385_v33  ;;  %v2849_v21 = vld [vmem:[#allocation16 + $0x4] sm:$0xf]  ;;  %v2274_v22 = vor.u32 %v2850_v20, %v2273_v19  ;;  %v2872_v26 = vld [vmem:[#allocation16 + $0xb4] sm:$0xf0] }
 0x1d7   :  { %v776_v44 = vadd.f32 %v774_v41, %v765_v0  ;;  %v777_v45 = vadd.f32 %v775_v1, %v766_v36  ;;  %815 = vmatpush.bf16.xpose.msra.mxu0 %v806_v43  ;;  %865 = vmatpush.bf16.xpose.msra.mxu2 %v806_v43  ;;  %v2857_v36 = vld [vmem:[#allocation16 + $0x44] sm:$0xf]  ;;  %v2387_v40 = vld [vmem:[#allocation16 + $0xe8] sm:$0xf0]  ;;  %v2377_v41 = vld [vmem:[#allocation16 + $0xd0] sm:$0xf]  ;;  %v2306_v43 = vor.u32 %v2858_v30, %v2305_v29 }
 0x1d8   :  { %1132 = vmatpush.bf16.msrb.mxu3 %v2398_v31  ;;  %v2390_v0 = vor.u32 %v2877_v35, %v2387_v40  ;;  %1107 = vmatpush.bf16.msrb.mxu1 %v2386_v38  ;;  %v2278_v24 = vor.u32 %v2849_v21, %v2275_v23  ;;  %v2871_v27 = vld [vmem:[#allocation16 + $0xb4] sm:$0xf]  ;;  %v2363_v29 = vld [vmem:[#allocation16 + $0xb8] sm:$0xf0]  ;;  %v2353_v31 = vld [vmem:[#allocation16 + $0xa0] sm:$0xf] }
 0x1d9   :  { %v803_v46 = vmul.f32 0.088388346, %v776_v44  ;;  %v804_v47 = vmul.f32 0.088388346, %v777_v45  ;;  %v2876_v44 = vld [vmem:[#allocation16 + $0xd4] sm:$0xf0]  ;;  %v2366_v30 = vor.u32 %v2871_v27, %v2363_v29 }
 0x1da   :  { %v2875_v45 = vld [vmem:[#allocation16 + $0xd4] sm:$0xf]  ;;  %v2355_v34 = vld [vmem:[#allocation16 + $0xa8] sm:$0xf0]  ;;  %v2609_v19 = vld [vmem:[#allocation17 + $0x1a0] sm:$0xf] }
 0x1db   :  { %v805_v42 = vpack.c.bf16 %v804_v47, %v803_v46  ;;  %v2379_v46 = vld [vmem:[#allocation16 + $0xd8] sm:$0xf0]  ;;  %v2310_v47 = vor.u32 %v2857_v36, %v2307_v37  ;;  %v2345_v36 = vld [vmem:[#allocation16 + $0x90] sm:$0xf]  ;;  %v2868_v37 = vld [vmem:[#allocation16 + $0x94] sm:$0xf0] }
 0x1dc   :  { %1133 = vmatpush.bf16.msrb.mxu3 %v2390_v0  ;;  %v2867_v38 = vld [vmem:[#allocation16 + $0x94] sm:$0xf]  ;;  %v2346_v40 = vor.u32 %v2868_v37, %v2345_v36  ;;  %v2347_v0 = vld [vmem:[#allocation16 + $0x98] sm:$0xf0]  ;;  %v2935_v20 = vld [vmem:[#allocation17 + $0x1ac] sm:$0xf0] }
 0x1dd   :  { %v855_v48 = vunpack.c.h.b16 %v805_v42  ;;  %v2901_v21 = vld [vmem:[#allocation17 + $0xa4] sm:$0xf]  ;;  %v2483_v23 = vld [vmem:[#allocation17 + $0xb0] sm:$0xf0]  ;;  %v2610_v27 = vor.u32 %v2935_v20, %v2609_v19  ;;  %v2465_v29 = vld [vmem:[#allocation17 + $0x80] sm:$0xf] }
 0x1de   :  { %816 = vmatmul.bf16.vlgmr.msra.gmra.mxu0 %v805_v42  ;;  %v2297_v42 = vld [vmem:[#allocation16 + $0x30] sm:$0xf]  ;;  %v2929_v36 = vld [vmem:[#allocation17 + $0x184] sm:$0xf]  ;;  %v2595_v37 = vld [vmem:[#allocation17 + $0x190] sm:$0xf0] }
 0x1df   :  { %v856_v49 = vpack.c.b16 %v855_v48, %v855_v48  ;;  %1093 = vmatpush.bf16.msrb.mxu0 %v2330_v9  ;;  %1119 = vmatpush.bf16.msrb.mxu2 %v2334_v13  ;;  %v2856_v48 = vld [vmem:[#allocation16 + $0x34] sm:$0xf0]  ;;  %v2281_v9 = vld [vmem:[#allocation16 + $0x10] sm:$0xf]  ;;  %v2283_v13 = vld [vmem:[#allocation16 + $0x18] sm:$0xf0] }
 0x1e0   :  { %v2282_v14 = vor.u32 %v2852_v10, %v2281_v9  ;;  %v2286_v15 = vor.u32 %v2851_v12, %v2283_v13  ;;  %v2499_v12 = vld [vmem:[#allocation17 + $0xd0] sm:$0xf0]  ;;  %v2937_v13 = vld [vmem:[#allocation17 + $0x1c4] sm:$0xf]  ;;  %v2887_v19 = vld [vmem:[#allocation17 + $0x2c] sm:$0xf0] }
 0x1e1   :  { %866 = vmatmul.bf16.vlgmr.msra.gmra.mxu2 %v856_v49  ;;  %v2855_v49 = vld [vmem:[#allocation16 + $0x34] sm:$0xf]  ;;  %v2545_v20 = vld [vmem:[#allocation17 + $0x120] sm:$0xf] }
 0x1e3   :  { %1094 = vmatpush.bf16.msrb.mxu0 %v2322_v17  ;;  %1120 = vmatpush.bf16.msrb.mxu2 %v2326_v18 }
 0x1e7   :  { %1095 = vmatpush.bf16.msrb.mxu0 %v2314_v28  ;;  %1121 = vmatpush.bf16.msrb.mxu2 %v2318_v32  ;;  %v2362_v28 = vor.u32 %v2872_v26, %v2361_v25  ;;  %v2869_v32 = vld [vmem:[#allocation16 + $0xa4] sm:$0xf]  ;;  %v2611_v25 = vld [vmem:[#allocation17 + $0x1b0] sm:$0xf0] }
 0x1e8   :  { %v2358_v35 = vor.u32 %v2869_v32, %v2355_v34  ;;  %v2931_v32 = vld [vmem:[#allocation17 + $0x18c] sm:$0xf0]  ;;  %v2467_v34 = vld [vmem:[#allocation17 + $0x90] sm:$0xf0] }
 0x1eb   :  { %1096 = vmatpush.bf16.msrb.mxu0 %v2306_v43  ;;  %1122 = vmatpush.bf16.msrb.mxu2 %v2310_v47  ;;  %v2866_v43 = vld [vmem:[#allocation16 + $0x84] sm:$0xf0] }
 0x25b   :  { %v817_v51 = vpop.f32.mrf.mxu0 }
 0x25c   :  { %v818_v52 = vadd.f32 %v817_v51, %v802_v50  ;;  %v2299_v51 = vld [vmem:[#allocation16 + $0x38] sm:$0xf0] }
 0x25e   :  { %v822_v53 = vsel %vm821_vm8, %v818_v52, -inf }
 0x25f   :  { %823 = vmax.xlane.f32.xlu1 %v822_v53  ;;  %v2369_v53 = vld [vmem:[#allocation16 + $0xc0] sm:$0xf] }
 0x263   :  { %v819_v54 = vpop.f32.mrf.mxu0 }
 0x264   :  { %v867_v16 = vpop.f32.mrf.mxu2  ;;  %v2874_v54 = vld [vmem:[#allocation16 + $0xc4] sm:$0xf0] }
 0x265   :  { %v868_v55 = vadd.f32 %v867_v16, %v802_v50  ;;  %v2378_v50 = vor.u32 %v2876_v44, %v2377_v41  ;;  %v2873_v16 = vld [vmem:[#allocation16 + $0xc4] sm:$0xf]  ;;  %v2350_v41 = vor.u32 %v2867_v38, %v2347_v0 }
 0x266   :  { %v2865_v44 = vld [vmem:[#allocation16 + $0x84] sm:$0xf] }
 0x267   :  { %v871_v56 = vsel %vm821_vm8, %v868_v55, -inf  ;;  %1108 = vmatpush.bf16.msrb.mxu1 %v2378_v50 }
 0x268   :  { %872 = vmax.xlane.f32.xlu2 %v871_v56  ;;  %v2298_v56 = vor.u32 %v2856_v48, %v2297_v42 }
 0x26a   :  { %1097 = vmatpush.bf16.msrb.mxu0 %v2298_v56  ;;  %v2943_v56 = vld [vmem:[#allocation17 + $0x1ec] sm:$0xf0] }
 0x26c   :  { %v869_v57 = vpop.f32.mrf.mxu2 }
 0x26d   :  { %v2302_v57 = vor.u32 %v2855_v49, %v2299_v51 }
 0x26f   :  { %1123 = vmatpush.bf16.msrb.mxu2 %v2302_v57  ;;  %v2909_v57 = vld [vmem:[#allocation17 + $0xe4] sm:$0xf] }
 0x2d2   :  { %v824_v58 = vpop.xlane.xlu1 %823 }
 0x2d3   :  { %v825_v59 = vsub.f32 %v818_v52, %v824_v58  ;;  %v2382_v52 = vor.u32 %v2875_v45, %v2379_v46  ;;  %v2289_v58 = vld [vmem:[#allocation16 + $0x20] sm:$0xf]  ;;  %v2339_v46 = vld [vmem:[#allocation16 + $0x88] sm:$0xf0] }
 0x2d4   :  { %v2342_v47 = vor.u32 %v2865_v44, %v2339_v46  ;;  %v3020_v46 = vld [vmem:[#allocation2] sm:$0xff] }
 0x2d5   :  { %v826_v60 = vmul.f32 1.442695, %v825_v59  ;;  %v2854_v59 = vld [vmem:[#allocation16 + $0x24] sm:$0xf0]  ;;  %1134 = vmatpush.bf16.msrb.mxu3 %v2382_v52 }
 0x2d6   :  { %v2290_v6 = vor.u32 %v2854_v59, %v2289_v58  ;;  %v2515_v58 = vld [vmem:[#allocation17 + $0xf0] sm:$0xf0] }
 0x2d7   :  { %3002 = vpow2.f32 %v826_v60  ;;  %v2370_v60 = vor.u32 %v2874_v54, %v2369_v53  ;;  %v2513_v53 = vld [vmem:[#allocation17 + $0xe0] sm:$0xf]  ;;  %v2911_v54 = vld [vmem:[#allocation17 + $0xec] sm:$0xf0] }
 0x2d8   :  { %1098 = vmatpush.bf16.msrb.mxu0 %v2290_v6  ;;  %v2907_v6 = vld [vmem:[#allocation17 + $0xcc] sm:$0xf0] }
 0x2d9   :  { %1109 = vmatpush.bf16.msrb.mxu1 %v2370_v60 }
 0x2db   :  { %v873_v61 = vpop.xlane.xlu2 %872 }
 0x2dc   :  { %v874_v62 = vsub.f32 %v868_v55, %v873_v61  ;;  %v2371_v55 = vld [vmem:[#allocation16 + $0xc8] sm:$0xf0]  ;;  %v2853_v61 = vld [vmem:[#allocation16 + $0x24] sm:$0xf]  ;;  %1099 = vmatpush.bf16.msrb.mxu0 %v2282_v14 }
 0x2dd   :  { %v3557_v63 = vpop.eup %3002  ;;  %1110 = vmatpush.bf16.msrb.mxu1 %v2362_v28  ;;  %v2486_v28 = vor.u32 %v2901_v21, %v2483_v23  ;;  %v2885_v23 = vld [vmem:[#allocation17 + $0x24] sm:$0xf] }
 0x2de   :  { %v875_v2 = vmul.f32 1.442695, %v874_v62  ;;  %v828_v3 = vsel %vm821_vm8, %v3557_v63, 0.0  ;;  %v2291_v62 = vld [vmem:[#allocation16 + $0x28] sm:$0xf0] }
 0x2df   :  { %829 = vadd.xlane.f32.xlu2 %v828_v3  ;;  %v2294_v8 = vor.u32 %v2853_v61, %v2291_v62  ;;  %v2518_v61 = vor.u32 %v2909_v57, %v2515_v58  ;;  %v2941_v62 = vld [vmem:[#allocation17 + $0x1e4] sm:$0xf]  ;;  %v2927_v58 = vld [vmem:[#allocation17 + $0x16c] sm:$0xf0] }
 0x2e0   :  { %3004 = vpow2.f32 %v875_v2  ;;  %v2374_v2 = vor.u32 %v2873_v16, %v2371_v55  ;;  %1100 = vmatpush.bf16.msrb.mxu0 %v2274_v22  ;;  %v2641_v16 = vld [vmem:[#allocation17 + $0x1e0] sm:$0xf]  ;;  %v2514_v55 = vor.u32 %v2911_v54, %v2513_v53 }
 0x2e1   :  { %1124 = vmatpush.bf16.msrb.mxu2 %v2294_v8  ;;  %v2642_v60 = vor.u32 %v2943_v56, %v2641_v16  ;;  %v2939_v8 = vld [vmem:[#allocation17 + $0x1cc] sm:$0xf0]  ;;  %v2449_v16 = vld [vmem:[#allocation17 + $0x60] sm:$0xf] }
 0x2e2   :  { %1135 = vmatpush.bf16.msrb.mxu3 %v2374_v2  ;;  %v2643_v2 = vld [vmem:[#allocation17 + $0x1f0] sm:$0xf0]  ;;  %v2577_v56 = vld [vmem:[#allocation17 + $0x160] sm:$0xf] }
 0x2e4   :  { %1560 = vmatpush.bf16.msra.mxu0 %v2514_v55  ;;  %v2895_v55 = vld [vmem:[#allocation17 + $0x6c] sm:$0xf0] }
 0x2e5   :  { %1125 = vmatpush.bf16.msrb.mxu2 %v2286_v15  ;;  %v2627_v15 = vld [vmem:[#allocation17 + $0x1d0] sm:$0xf0]  ;;  %v2450_v57 = vor.u32 %v2895_v55, %v2449_v16 }
 0x2e6   :  { %v3561_v4 = vpop.eup %3004  ;;  %1136 = vmatpush.bf16.msrb.mxu3 %v2366_v30  ;;  %v2899_v30 = vld [vmem:[#allocation17 + $0x8c] sm:$0xf0] }
 0x2e7   :  { %v877_v5 = vsel %vm821_vm8, %v3561_v4, 0.0  ;;  %v2466_v38 = vor.u32 %v2899_v30, %v2465_v29  ;;  %v2401_v30 = vld [vmem:[#allocation17] sm:$0xf] }
 0x2e8   :  { %878 = vadd.xlane.f32.xlu0 %v877_v5 }
 0x2e9   :  { %1126 = vmatpush.bf16.msrb.mxu2 %v2278_v24  ;;  %v2933_v24 = vld [vmem:[#allocation17 + $0x1a4] sm:$0xf] }
 0x2ea   :  { %1137 = vmatpush.bf16.msrb.mxu3 %v2358_v35 }
 0x2ed   :  { %1586 = vmatpush.bf16.msra.mxu2 %v2518_v61  ;;  %v2578_v61 = vor.u32 %v2927_v58, %v2577_v56  ;;  %v2633_v56 = vld [vmem:[#allocation17 + $0x1c8] sm:$0xf]  ;;  %v2906_v58 = vld [vmem:[#allocation17 + $0xcc] sm:$0xf] }
 0x2ee   :  { %1138 = vmatpush.bf16.msrb.mxu3 %v2350_v41  ;;  %v2598_v41 = vor.u32 %v2929_v36, %v2595_v37 }
 0x2f2   :  { %1139 = vmatpush.bf16.msrb.mxu3 %v2342_v47 }
 0x352   :  { %v830_v1 = vpop.xlane.xlu2 %829 }
 0x353   :  { %3006 = vrcp.f32 %v830_v1  ;;  %v2337_v1 = vld [vmem:[#allocation16 + $0x80] sm:$0xf] }
 0x354   :  { %v2338_v45 = vor.u32 %v2866_v43, %v2337_v1 }
 0x359   :  { %v3007_v3 = vpop.eup %3006 }
 0x35a   :  { %v832_v5 = vmul.f32 %v3007_v3, %v3557_v63  ;;  %v2497_v3 = vld [vmem:[#allocation17 + $0xc0] sm:$0xf] }
 0x35b   :  { %v879_v7 = vpop.xlane.xlu0 %878  ;;  %v2498_v9 = vor.u32 %v2907_v6, %v2497_v3  ;;  %v2579_v3 = vld [vmem:[#allocation17 + $0x170] sm:$0xf0]  ;;  %v2433_v6 = vld [vmem:[#allocation17 + $0x40] sm:$0xf] }
 0x35c   :  { %v833_v11 = vpack.c.bf16 %v832_v5, %v832_v5  ;;  %3008 = vrcp.f32 %v879_v7  ;;  %v2646_v5 = vor.u32 %v2941_v62, %v2643_v2  ;;  %v2625_v7 = vld [vmem:[#allocation17 + $0x1c0] sm:$0xf]  ;;  %v2925_v2 = vld [vmem:[#allocation17 + $0x164] sm:$0xf] }
 0x35d   :  { %v2626_v10 = vor.u32 %v2939_v8, %v2625_v7  ;;  %1561 = vmatpush.bf16.msra.mxu0 %v2498_v9  ;;  %v2891_v7 = vld [vmem:[#allocation17 + $0x4c] sm:$0xf0]  ;;  %v2561_v8 = vld [vmem:[#allocation17 + $0x140] sm:$0xf] }
 0x35e   :  { %2269 = vmatmul.msk.bf16.vlgmr.msra.gmra.mxu1 %vm821_vm8, %v833_v11  ;;  %v2905_v11 = vld [vmem:[#allocation17 + $0xc4] sm:$0xf]  ;;  %v2434_v9 = vor.u32 %v2891_v7, %v2433_v6  ;;  %v2904_v6 = vld [vmem:[#allocation17 + $0xb4] sm:$0xf0]  ;;  %v2617_v7 = vld [vmem:[#allocation17 + $0x1a8] sm:$0xf] }
 0x35f   :  { %v2502_v14 = vor.u32 %v2905_v11, %v2499_v12  ;;  %v2889_v11 = vld [vmem:[#allocation17 + $0x44] sm:$0xf]  ;;  %v2435_v12 = vld [vmem:[#allocation17 + $0x50] sm:$0xf0] }
 0x361   :  { %1587 = vmatpush.bf16.msra.mxu2 %v2502_v14  ;;  %v2438_v14 = vor.u32 %v2889_v11, %v2435_v12  ;;  %v2491_v11 = vld [vmem:[#allocation17 + $0xb8] sm:$0xf0] }
 0x362   :  { %v3009_v63 = vpop.eup %3008 }
 0x363   :  { %v881_v17 = vmul.f32 %v3009_v63, %v3561_v4  ;;  %v2870_v4 = vld [vmem:[#allocation16 + $0xa4] sm:$0xf0]  ;;  %v2481_v63 = vld [vmem:[#allocation17 + $0xa0] sm:$0xf] }
 0x364   :  { %v2354_v33 = vor.u32 %v2870_v4, %v2353_v31  ;;  %v2593_v31 = vld [vmem:[#allocation17 + $0x180] sm:$0xf]  ;;  %v2614_v4 = vor.u32 %v2933_v24, %v2611_v25  ;;  %v2419_v24 = vld [vmem:[#allocation17 + $0x30] sm:$0xf0] }
 0x365   :  { %v882_v18 = vpack.c.bf16 %v881_v17, %v881_v17  ;;  %v2903_v17 = vld [vmem:[#allocation17 + $0xac] sm:$0xf0]  ;;  %1588 = vmatpush.bf16.msra.mxu2 %v2486_v28  ;;  %v2547_v28 = vld [vmem:[#allocation17 + $0x130] sm:$0xf0] }
 0x366   :  { %1111 = vmatpush.bf16.msrb.mxu1 %v2354_v33  ;;  %v2482_v22 = vor.u32 %v2903_v17, %v2481_v63  ;;  %v2897_v33 = vld [vmem:[#allocation17 + $0x84] sm:$0xf]  ;;  %v2563_v63 = vld [vmem:[#allocation17 + $0x150] sm:$0xf0] }
 0x367   :  { %2270 = vmatmul.msk.bf16.vlgmr.msra.gmra.mxu3 %vm821_vm8, %v882_v18  ;;  %v2630_v18 = vor.u32 %v2937_v13, %v2627_v15  ;;  %v2470_v0 = vor.u32 %v2897_v33, %v2467_v34  ;;  %v2921_v15 = vld [vmem:[#allocation17 + $0x144] sm:$0xf]  ;;  %v2915_v33 = vld [vmem:[#allocation17 + $0x10c] sm:$0xf0] }
 0x368   :  { %1599 = vmatpush.bf16.msra.mxu3 %v2646_v5  ;;  %1562 = vmatpush.bf16.msra.mxu0 %v2482_v22  ;;  %v2582_v5 = vor.u32 %v2925_v2, %v2579_v3  ;;  %v2566_v17 = vor.u32 %v2921_v15, %v2563_v63  ;;  %v2919_v22 = vld [vmem:[#allocation17 + $0x12c] sm:$0xf0]  ;;  %v2881_v34 = vld [vmem:[#allocation17 + $0x4] sm:$0xf]  ;;  %v2619_v15 = vld [vmem:[#allocation17 + $0x1b8] sm:$0xf0] }
 0x369   :  { %1589 = vmatpush.bf16.msra.mxu2 %v2470_v0  ;;  %v2546_v25 = vor.u32 %v2919_v22, %v2545_v20  ;;  %v2521_v0 = vld [vmem:[#allocation17 + $0xe8] sm:$0xf]  ;;  %v2932_v20 = vld [vmem:[#allocation17 + $0x194] sm:$0xf0]  ;;  %v2475_v22 = vld [vmem:[#allocation17 + $0x98] sm:$0xf0] }
 0x36a   :  { %1112 = vmatpush.bf16.msrb.mxu1 %v2346_v40  ;;  %v2594_v40 = vor.u32 %v2931_v32, %v2593_v31  ;;  %v2883_v31 = vld [vmem:[#allocation17 + $0xc] sm:$0xf0] }
 0x36b   :  { %v2402_v32 = vor.u32 %v2883_v31, %v2401_v30  ;;  %v2896_v30 = vld [vmem:[#allocation17 + $0x74] sm:$0xf0]  ;;  %v2585_v31 = vld [vmem:[#allocation17 + $0x168] sm:$0xf] }
 0x36c   :  { %1600 = vmatpush.bf16.msra.mxu3 %v2630_v18  ;;  %1563 = vmatpush.bf16.msra.mxu0 %v2466_v38  ;;  %v2417_v18 = vld [vmem:[#allocation17 + $0x20] sm:$0xf]  ;;  %v2913_v38 = vld [vmem:[#allocation17 + $0x104] sm:$0xf] }
 0x36d   :  { %v2418_v21 = vor.u32 %v2887_v19, %v2417_v18  ;;  %v2900_v18 = vld [vmem:[#allocation17 + $0x94] sm:$0xf0]  ;;  %v2601_v19 = vld [vmem:[#allocation17 + $0x188] sm:$0xf] }
 0x36e   :  { %1113 = vmatpush.bf16.msrb.mxu1 %v2338_v45 }
 0x370   :  { %1601 = vmatpush.bf16.msra.mxu3 %v2614_v4  ;;  %1564 = vmatpush.bf16.msra.mxu0 %v2450_v57  ;;  %v2529_v4 = vld [vmem:[#allocation17 + $0x100] sm:$0xf]  ;;  %v2940_v57 = vld [vmem:[#allocation17 + $0x1d4] sm:$0xf0] }
 0x371   :  { %v2530_v36 = vor.u32 %v2915_v33, %v2529_v4  ;;  %v2894_v33 = vld [vmem:[#allocation17 + $0x6c] sm:$0xf] }
 0x372   :  { %1573 = vmatpush.bf16.msra.mxu1 %v2642_v60  ;;  %v2451_v60 = vld [vmem:[#allocation17 + $0x70] sm:$0xf0] }
 0x374   :  { %1602 = vmatpush.bf16.msra.mxu3 %v2598_v41  ;;  %1565 = vmatpush.bf16.msra.mxu0 %v2434_v9  ;;  %v2936_v9 = vld [vmem:[#allocation17 + $0x1b4] sm:$0xf0] }
 0x375   :  { %v2618_v12 = vor.u32 %v2936_v9, %v2617_v7  ;;  %v2537_v7 = vld [vmem:[#allocation17 + $0x108] sm:$0xf] }
 0x376   :  { %1574 = vmatpush.bf16.msra.mxu1 %v2626_v10  ;;  %v2923_v10 = vld [vmem:[#allocation17 + $0x14c] sm:$0xf0] }
 0x377   :  { %v2562_v13 = vor.u32 %v2923_v10, %v2561_v8  ;;  %v2902_v10 = vld [vmem:[#allocation17 + $0xac] sm:$0xf] }
 0x378   :  { %1603 = vmatpush.bf16.msra.mxu3 %v2582_v5  ;;  %1566 = vmatpush.bf16.msra.mxu0 %v2418_v21  ;;  %v2489_v5 = vld [vmem:[#allocation17 + $0xa8] sm:$0xf]  ;;  %v2898_v21 = vld [vmem:[#allocation17 + $0x8c] sm:$0xf] }
 0x379   :  { %v2490_v8 = vor.u32 %v2904_v6, %v2489_v5  ;;  %v2884_v6 = vld [vmem:[#allocation17 + $0x14] sm:$0xf0] }
 0x37a   :  { %1575 = vmatpush.bf16.msra.mxu1 %v2610_v27  ;;  %v2917_v27 = vld [vmem:[#allocation17 + $0x124] sm:$0xf] }
 0x37b   :  { %v2550_v29 = vor.u32 %v2917_v27, %v2547_v28  ;;  %v2478_v27 = vor.u32 %v2898_v21, %v2475_v22 }
 0x37c   :  { %1604 = vmatpush.bf16.msra.mxu3 %v2566_v17  ;;  %1567 = vmatpush.bf16.msra.mxu0 %v2402_v32  ;;  %v2473_v17 = vld [vmem:[#allocation17 + $0x88] sm:$0xf]  ;;  %v2928_v32 = vld [vmem:[#allocation17 + $0x174] sm:$0xf0] }
 0x37e   :  { %1576 = vmatpush.bf16.msra.mxu1 %v2594_v40  ;;  %v2531_v40 = vld [vmem:[#allocation17 + $0x110] sm:$0xf0] }
 0x37f   :  { %v2534_v41 = vor.u32 %v2913_v38, %v2531_v40  ;;  %v2587_v38 = vld [vmem:[#allocation17 + $0x178] sm:$0xf0]  ;;  %v2441_v40 = vld [vmem:[#allocation17 + $0x48] sm:$0xf] }
 0x380   :  { %1605 = vmatpush.bf16.msra.mxu3 %v2550_v29  ;;  %v2457_v29 = vld [vmem:[#allocation17 + $0x68] sm:$0xf] }
 0x381   :  { %v2458_v4 = vor.u32 %v2896_v30, %v2457_v29 }
 0x382   :  { %1577 = vmatpush.bf16.msra.mxu1 %v2578_v61  ;;  %v2938_v61 = vld [vmem:[#allocation17 + $0x1cc] sm:$0xf] }
 0x384   :  { %1606 = vmatpush.bf16.msra.mxu3 %v2534_v41  ;;  %v2892_v41 = vld [vmem:[#allocation17 + $0x54] sm:$0xf0] }
 0x386   :  { %1578 = vmatpush.bf16.msra.mxu1 %v2562_v13  ;;  %v2494_v13 = vor.u32 %v2902_v10, %v2491_v11  ;;  %v2882_v10 = vld [vmem:[#allocation17 + $0xc] sm:$0xf]  ;;  %v2411_v11 = vld [vmem:[#allocation17 + $0x18] sm:$0xf0] }
 0x38a   :  { %1579 = vmatpush.bf16.msra.mxu1 %v2546_v25  ;;  %v2930_v25 = vld [vmem:[#allocation17 + $0x18c] sm:$0xf] }
 0x38e   :  { %1580 = vmatpush.bf16.msra.mxu1 %v2530_v36 }
 0x3db   :  { %v850_v42 = vpop.f32.mrf.mxu1 }
 0x3dc   :  { %v899_v48 = vpack.c.bf16 %v850_v42, %v850_v42 }
 0x3de   :  { %1101 = vmatmul.bf16.vlgmr.msrb.gmra.mxu0 %v899_v48  ;;  %1127 = vmatmul.bf16.vlgmr.msrb.gmra.mxu2 %v899_v48 }
 0x3e3   :  { %v852_v49 = vpop.f32.mrf.mxu1 }
 0x3e4   :  { %v3021_v49 = vld [vmem:[#allocation2 + $0x8] sm:$0xff] }
 0x3ea   :  { %v895_v50 = vpop.f32.mrf.mxu3 }
 0x3eb   :  { %v900_v51 = vpack.c.bf16 %v895_v50, %v895_v50 }
 0x3ed   :  { %1114 = vmatmul.bf16.vlgmr.msrb.gmra.mxu1 %v900_v51  ;;  %1140 = vmatmul.bf16.vlgmr.msrb.gmra.mxu3 %v900_v51 }
 0x3f2   :  { %v897_v52 = vpop.f32.mrf.mxu3 }
 0x45b   :  { %v1102_v59 = vpop.f32.mrf.mxu0 }
 0x461   :  { %v1128_v26 = vpop.f32.mrf.mxu2 }
 0x463   :  { %v1104_v35 = vpop.f32.mrf.mxu0 }
 0x464   :  { %v2403_v35 = vld [vmem:[#allocation17 + $0x10] sm:$0xf0] }
 0x465   :  { %v2406_v37 = vor.u32 %v2881_v34, %v2403_v35  ;;  %v2459_v34 = vld [vmem:[#allocation17 + $0x78] sm:$0xf0]  ;;  %v2586_v35 = vor.u32 %v2928_v32, %v2585_v31 }
 0x466   :  { %v2462_v36 = vor.u32 %v2894_v33, %v2459_v34  ;;  %v2715_v33 = vld [vmem:[#allocation19 + $0x70] sm:$0xf]  ;;  %v2960_v34 = vld [vmem:[#allocation19 + $0x74] sm:$0xf0] }
 0x469   :  { %v1130_v1 = vpop.f32.mrf.mxu2 }
 0x46a   :  { %v1115_v43 = vpop.f32.mrf.mxu1  ;;  %v2912_v1 = vld [vmem:[#allocation17 + $0xf4] sm:$0xf0] }
 0x46b   :  { %v1116_v44 = vadd.f32 %v1115_v43, %v1102_v59  ;;  %v2893_v59 = vld [vmem:[#allocation17 + $0x64] sm:$0xf]  ;;  %v2649_v43 = vld [vmem:[#allocation17 + $0x1e8] sm:$0xf] }
 0x46c   :  { %v2454_v62 = vor.u32 %v2893_v59, %v2451_v60  ;;  %v2634_v59 = vor.u32 %v2940_v57, %v2633_v56  ;;  %v2507_v60 = vld [vmem:[#allocation17 + $0xd8] sm:$0xf0]  ;;  %v2920_v56 = vld [vmem:[#allocation17 + $0x134] sm:$0xf0] }
 0x46d   :  { %v3569_v47 = vadd.f32 %v3020_v46, %v1116_v44  ;;  %v2944_v44 = vld [vmem:[#allocation17 + $0x1f4] sm:$0xf0]  ;;  %v2510_v2 = vor.u32 %v2906_v58, %v2507_v60  ;;  %v2427_v60 = vld [vmem:[#allocation17 + $0x38] sm:$0xf0] }
 0x46e   :  { %1590 = vmatpush.bf16.msra.mxu2 %v2454_v62  ;;  %v2650_v46 = vor.u32 %v2944_v44, %v2649_v43  ;;  %v2635_v62 = vld [vmem:[#allocation17 + $0x1d8] sm:$0xf0]  ;;  %v2924_v43 = vld [vmem:[#allocation17 + $0x154] sm:$0xf0] }
 0x46f   :  { %v1148_v51 = vmul.f32 %v3569_v47, %v3569_v47  ;;  %v2638_v3 = vor.u32 %v2938_v61, %v2635_v62  ;;  %v2918_v61 = vld [vmem:[#allocation17 + $0x12c] sm:$0xf]  ;;  %v2555_v62 = vld [vmem:[#allocation17 + $0x138] sm:$0xf0] }
 0x470   :  { %v1141_v45 = vpop.f32.mrf.mxu3  ;;  %1625 = vmatpush.bf16.msrb.mxu1 %v2650_v46  ;;  %v2443_v46 = vld [vmem:[#allocation17 + $0x58] sm:$0xf0]  ;;  %v2558_v9 = vor.u32 %v2918_v61, %v2555_v62  ;;  %v2773_v61 = vld [vmem:[#allocation19 + $0xe8] sm:$0xf0] }
 0x471   :  { %v1142_v42 = vadd.f32 %v1141_v45, %v1128_v26  ;;  %v2422_v26 = vor.u32 %v2885_v23, %v2419_v24  ;;  %v2522_v45 = vor.u32 %v2912_v1, %v2521_v0  ;;  %v2474_v23 = vor.u32 %v2900_v18, %v2473_v17  ;;  %v2569_v1 = vld [vmem:[#allocation17 + $0x148] sm:$0xf] }
 0x472   :  { %v1117_v48 = vpop.f32.mrf.mxu1  ;;  %1591 = vmatpush.bf16.msra.mxu2 %v2438_v14  ;;  %v2934_v14 = vld [vmem:[#allocation17 + $0x1ac] sm:$0xf]  ;;  %v2602_v24 = vor.u32 %v2932_v20, %v2601_v19 }
 0x473   :  { %v3571_v50 = vadd.f32 %v3021_v49, %v1142_v42  ;;  %v2910_v42 = vld [vmem:[#allocation17 + $0xec] sm:$0xf]  ;;  %v2523_v48 = vld [vmem:[#allocation17 + $0xf8] sm:$0xf0]  ;;  %1612 = vmatpush.bf16.msrb.mxu0 %v2522_v45  ;;  %v2622_v63 = vor.u32 %v2934_v14, %v2619_v15 }
 0x474   :  { %v2942_v49 = vld [vmem:[#allocation17 + $0x1ec] sm:$0xf]  ;;  %1626 = vmatpush.bf16.msrb.mxu1 %v2634_v59 }
 0x475   :  { %v1149_v52 = vmul.f32 %v3571_v50, %v3571_v50  ;;  %v2890_v45 = vld [vmem:[#allocation17 + $0x4c] sm:$0xf] }
 0x476   :  { %1592 = vmatpush.bf16.msra.mxu2 %v2422_v26  ;;  %v2603_v26 = vld [vmem:[#allocation17 + $0x198] sm:$0xf0]  ;;  %v2886_v59 = vld [vmem:[#allocation17 + $0x2c] sm:$0xf] }
 0x477   :  { %v1150_v53 = vadd.f32 %v1149_v52, %v1148_v51  ;;  %v2526_v51 = vor.u32 %v2910_v42, %v2523_v48  ;;  %v2651_v52 = vld [vmem:[#allocation17 + $0x1f8] sm:$0xf0]  ;;  %v2606_v28 = vor.u32 %v2930_v25, %v2603_v26  ;;  %v2922_v42 = vld [vmem:[#allocation17 + $0x14c] sm:$0xf]  ;;  %v2430_v5 = vor.u32 %v2886_v59, %v2427_v60  ;;  %v2973_v59 = vld [vmem:[#allocation19 + $0xe4] sm:$0xf] }
 0x478   :  { %v1143_v54 = vpop.f32.mrf.mxu3  ;;  %v2654_v16 = vor.u32 %v2942_v49, %v2651_v52  ;;  %1627 = vmatpush.bf16.msrb.mxu1 %v2618_v12  ;;  %v2442_v49 = vor.u32 %v2892_v41, %v2441_v40  ;;  %v2571_v52 = vld [vmem:[#allocation17 + $0x158] sm:$0xf0]  ;;  %v2914_v12 = vld [vmem:[#allocation17 + $0x10c] sm:$0xf]  ;;  %v2707_v40 = vld [vmem:[#allocation19 + $0x60] sm:$0xf]  ;;  %v2776_v62 = vor.u32 %v2973_v59, %v2773_v61 }
 0x479   :  { %1151 = vadd.xlane.f32.xlu2 %v1150_v53  ;;  %v2505_v53 = vld [vmem:[#allocation17 + $0xc8] sm:$0xf]  ;;  %v2908_v54 = vld [vmem:[#allocation17 + $0xd4] sm:$0xf0]  ;;  %v2574_v58 = vor.u32 %v2922_v42, %v2571_v52  ;;  %v2957_v41 = vld [vmem:[#allocation19 + $0x64] sm:$0xf] }
 0x47a   :  { %1593 = vmatpush.bf16.msra.mxu2 %v2406_v37  ;;  %v2506_v55 = vor.u32 %v2908_v54, %v2505_v53  ;;  %1651 = vmatpush.bf16.msrb.mxu3 %v2654_v16  ;;  %v2926_v37 = vld [vmem:[#allocation17 + $0x16c] sm:$0xf]  ;;  %v2425_v53 = vld [vmem:[#allocation17 + $0x28] sm:$0xf]  ;;  %v2446_v54 = vor.u32 %v2890_v45, %v2443_v46  ;;  %v2888_v16 = vld [vmem:[#allocation17 + $0x34] sm:$0xf0] }
 0x47b   :  { %v2590_v0 = vor.u32 %v2926_v37, %v2587_v38  ;;  %v2717_v37 = vld [vmem:[#allocation19 + $0x78] sm:$0xf0]  ;;  %v2779_v45 = vld [vmem:[#allocation19 + $0xf0] sm:$0xf]  ;;  %v2976_v46 = vld [vmem:[#allocation19 + $0xf4] sm:$0xf0] }
 0x47c   :  { %1613 = vmatpush.bf16.msrb.mxu0 %v2506_v55  ;;  %1628 = vmatpush.bf16.msrb.mxu1 %v2602_v24  ;;  %v2553_v55 = vld [vmem:[#allocation17 + $0x128] sm:$0xf]  ;;  %v2975_v42 = vld [vmem:[#allocation19 + $0xf4] sm:$0xf]  ;;  %v2699_v52 = vld [vmem:[#allocation19 + $0x50] sm:$0xf] }
 0x47d   :  { %v2731_v59 = vld [vmem:[#allocation19 + $0x90] sm:$0xf] }
 0x47e   :  { %1638 = vmatpush.bf16.msrb.mxu2 %v2526_v51  ;;  %1652 = vmatpush.bf16.msrb.mxu3 %v2638_v3  ;;  %v2570_v51 = vor.u32 %v2924_v43, %v2569_v1  ;;  %v2409_v3 = vld [vmem:[#allocation17 + $0x8] sm:$0xf]  ;;  %v2709_v43 = vld [vmem:[#allocation19 + $0x68] sm:$0xf0] }
 0x47f   :  { %v2410_v14 = vor.u32 %v2884_v6, %v2409_v3  ;;  %v2953_v3 = vld [vmem:[#allocation19 + $0x44] sm:$0xf]  ;;  %v2693_v6 = vld [vmem:[#allocation19 + $0x48] sm:$0xf0] }
 0x480   :  { %1614 = vmatpush.bf16.msrb.mxu0 %v2490_v8  ;;  %1629 = vmatpush.bf16.msrb.mxu1 %v2586_v35  ;;  %v2916_v8 = vld [vmem:[#allocation17 + $0x114] sm:$0xf0]  ;;  %v2959_v35 = vld [vmem:[#allocation19 + $0x74] sm:$0xf] }
 0x481   :  { %v2538_v15 = vor.u32 %v2916_v8, %v2537_v7  ;;  %v2720_v38 = vor.u32 %v2959_v35, %v2717_v37  ;;  %v2696_v7 = vor.u32 %v2953_v3, %v2693_v6  ;;  %v2763_v8 = vld [vmem:[#allocation19 + $0xd0] sm:$0xf]  ;;  %v2749_v35 = vld [vmem:[#allocation19 + $0xb8] sm:$0xf0]  ;;  %v2723_v6 = vld [vmem:[#allocation19 + $0x80] sm:$0xf] }
 0x482   :  { %1639 = vmatpush.bf16.msrb.mxu2 %v2510_v2  ;;  %1653 = vmatpush.bf16.msrb.mxu3 %v2622_v63  ;;  %v2554_v2 = vor.u32 %v2920_v56, %v2553_v55  ;;  %v2414_v63 = vor.u32 %v2882_v10, %v2411_v11  ;;  %v2701_v55 = vld [vmem:[#allocation19 + $0x58] sm:$0xf0]  ;;  %v2971_v10 = vld [vmem:[#allocation19 + $0xd4] sm:$0xf]  ;;  %v2667_v37 = vld [vmem:[#allocation19 + $0x10] sm:$0xf] }
 0x484   :  { %1615 = vmatpush.bf16.msrb.mxu0 %v2474_v23  ;;  %1630 = vmatpush.bf16.msrb.mxu1 %v2570_v51  ;;  %v1147_v23 = vld [vmem:[%s3615_s11] sm:$0x3]  ;;  %s3392_s11 = smov [#allocation21]  }
 0x485   :  { %v1168_v25 = vperm.slane %v1147_v23, 0  ;;  %v1169_v26 = vperm.slane %v1147_v23, 1  ;;  %s1971_s24 = sshll.u32 %s3392_s11, 4  ;;  %s1972_s24 = int_to_ptr.vmem [resolvable:$true] %s1971_s24 }
 0x486   :  { %1640 = vmatpush.bf16.msrb.mxu2 %v2494_v13  ;;  %1654 = vmatpush.bf16.msrb.mxu3 %v2606_v28  ;;  %v2539_v13 = vld [vmem:[#allocation17 + $0x118] sm:$0xf0]  ;;  %1979 = dma.vmem_to_hbm [thread:$0]  %s1972_s24, 256, %s1974_s27, [#allocation22], %s3386_s18, %s3386_s18, %s3387_s1  }
 0x487   :  { %v2542_v18 = vor.u32 %v2914_v12, %v2539_v13  ;;  %v2765_v12 = vld [vmem:[#allocation19 + $0xd8] sm:$0xf0]  ;;  %1992 = dma.vmem_to_hbm [thread:$0]  %s1985_s2, 256, %s1987_s30, [#allocation22], %s3386_s18, %s3386_s18, %s3387_s1  }
 0x488   :  { %1616 = vmatpush.bf16.msrb.mxu0 %v2458_v4  ;;  %1631 = vmatpush.bf16.msrb.mxu1 %v2554_v2  ;;  %v2954_v2 = vld [vmem:[#allocation19 + $0x44] sm:$0xf0]  ;;  %v2768_v13 = vor.u32 %v2971_v10, %v2765_v12 }
 0x48a   :  { %1641 = vmatpush.bf16.msrb.mxu2 %v2478_v27  ;;  %1655 = vmatpush.bf16.msrb.mxu3 %v2590_v0  ;;  %v2958_v0 = vld [vmem:[#allocation19 + $0x64] sm:$0xf0] }
 0x48b   :  { %v2708_v1 = vor.u32 %v2958_v0, %v2707_v40  ;;  %v2947_v40 = vld [vmem:[#allocation19 + $0x14] sm:$0xf] }
 0x48c   :  { %1617 = vmatpush.bf16.msrb.mxu0 %v2442_v49  ;;  %1632 = vmatpush.bf16.msrb.mxu1 %v2538_v15  ;;  %v2781_v49 = vld [vmem:[#allocation19 + $0xf8] sm:$0xf0]  ;;  %v2952_v15 = vld [vmem:[#allocation19 + $0x34] sm:$0xf0] }
 0x48d   :  { %v2784_v51 = vor.u32 %v2975_v42, %v2781_v49  ;;  %v2741_v49 = vld [vmem:[#allocation19 + $0xa8] sm:$0xf0] }
 0x48e   :  { %1642 = vmatpush.bf16.msrb.mxu2 %v2462_v36  ;;  %1656 = vmatpush.bf16.msrb.mxu3 %v2574_v58  ;;  %v2716_v36 = vor.u32 %v2960_v34, %v2715_v33  ;;  %v2974_v58 = vld [vmem:[#allocation19 + $0xe4] sm:$0xf0]  ;;  %v2967_v33 = vld [vmem:[#allocation19 + $0xb4] sm:$0xf] }
 0x492   :  { %1643 = vmatpush.bf16.msrb.mxu2 %v2446_v54  ;;  %1657 = vmatpush.bf16.msrb.mxu3 %v2558_v9  ;;  %v2955_v54 = vld [vmem:[#allocation19 + $0x54] sm:$0xf]  ;;  %v2972_v9 = vld [vmem:[#allocation19 + $0xd4] sm:$0xf0] }
 0x493   :  { %v2704_v56 = vor.u32 %v2955_v54, %v2701_v55  ;;  %v2764_v11 = vor.u32 %v2972_v9, %v2763_v8  ;;  %v2946_v54 = vld [vmem:[#allocation19 + $0x4] sm:$0xf0]  ;;  %v2961_v8 = vld [vmem:[#allocation19 + $0x84] sm:$0xf] }
 0x496   :  { %1644 = vmatpush.bf16.msrb.mxu2 %v2430_v5  ;;  %1658 = vmatpush.bf16.msrb.mxu3 %v2542_v18  ;;  %v2685_v18 = vld [vmem:[#allocation19 + $0x38] sm:$0xf0] }
 0x49a   :  { %1645 = vmatpush.bf16.msrb.mxu2 %v2414_v63  ;;  %v2951_v63 = vld [vmem:[#allocation19 + $0x34] sm:$0xf] }
 0x4ec   :  { %v1152_v44 = vpop.xlane.xlu2 %1151 }
 0x4ed   :  { %v1153_v48 = vmul.f32 %v1152_v44, %v3537_v39  ;;  %v2426_v39 = vor.u32 %v2888_v16, %v2425_v53  ;;  %v2712_v44 = vor.u32 %v2957_v41, %v2709_v43  ;;  %v2956_v53 = vld [vmem:[#allocation19 + $0x54] sm:$0xf0]  ;;  %v2669_v41 = vld [vmem:[#allocation19 + $0x18] sm:$0xf0]  ;;  %v2739_v43 = vld [vmem:[#allocation19 + $0xa0] sm:$0xf] }
 0x4ee   :  { %v2700_v16 = vor.u32 %v2956_v53, %v2699_v52  ;;  %v2659_v53 = vld [vmem:[#allocation19] sm:$0xf] }
 0x4ef   :  { %v1154_v57 = vadd.f32 1e-05, %v1153_v48  ;;  %1618 = vmatpush.bf16.msrb.mxu0 %v2426_v39  ;;  %v2780_v48 = vor.u32 %v2976_v46, %v2779_v45  ;;  %v2691_v39 = vld [vmem:[#allocation19 + $0x40] sm:$0xf]  ;;  %v2965_v45 = vld [vmem:[#allocation19 + $0xa4] sm:$0xf]  ;;  %v2660_v55 = vor.u32 %v2946_v54, %v2659_v53 }
 0x4f0   :  { %v2692_v5 = vor.u32 %v2954_v2, %v2691_v39  ;;  %v2744_v52 = vor.u32 %v2965_v45, %v2741_v49  ;;  %v2733_v39 = vld [vmem:[#allocation19 + $0x98] sm:$0xf0] }
 0x4f1   :  { %3010 = vrsqrt.f32 %v1154_v57  ;;  %vm1161_vm10 = vweird.f32 %v1154_v57 }
 0x4f3   :  { %1619 = vmatpush.bf16.msrb.mxu0 %v2410_v14  ;;  %v2683_v14 = vld [vmem:[#allocation19 + $0x30] sm:$0xf] }
 0x4f7   :  { %v3011_v17 = vpop.eup %3010 }
 0x4f8   :  { %v1156_v19 = vmul.f32 %v3011_v17, %v1154_v57  ;;  %vm1162_vm9 = vweird.f32 %v3011_v17  ;;  %v2771_v57 = vld [vmem:[#allocation19 + $0xe0] sm:$0xf] }
 0x4f9   :  { %vm1163_vm11 = vmor %vm1161_vm10, %vm1162_vm9  ;;  %v2772_v60 = vor.u32 %v2974_v58, %v2771_v57 }
 0x4fa   :  { %v1157_v20 = vmul.f32 %v3011_v17, %v1156_v19  ;;  %v2688_v19 = vor.u32 %v2951_v63, %v2685_v18 }
 0x4fc   :  { %v1158_v21 = vmul.f32 0.5, %v1157_v20  ;;  %v2755_v20 = vld [vmem:[#allocation19 + $0xc0] sm:$0xf] }
 0x4fe   :  { %v1159_v22 = vsub.f32 1.5, %v1158_v21  ;;  %v2970_v21 = vld [vmem:[#allocation19 + $0xc4] sm:$0xf0] }
 0x4ff   :  { %v2756_v23 = vor.u32 %v2970_v21, %v2755_v20 }
 0x500   :  { %v1160_v24 = vmul.f32 %v3011_v17, %v1159_v22  ;;  %v2969_v22 = vld [vmem:[#allocation19 + $0xc4] sm:$0xf] }
 0x502   :  { %v1164_v27 = vsel %vm1163_vm11, %v3011_v17, %v1160_v24  ;;  %v2684_v17 = vor.u32 %v2952_v15, %v2683_v14  ;;  %v2757_v24 = vld [vmem:[#allocation19 + $0xc8] sm:$0xf0] }
 0x503   :  { %v1165_v28 = vmul.f32 %v1164_v27, %v3569_v47  ;;  %v1166_v29 = vmul.f32 %v1164_v27, %v3571_v50  ;;  %v2950_v27 = vld [vmem:[#allocation19 + $0x24] sm:$0xf0] }
 0x505   :  { %v1172_v30 = vmul.f32 %v1168_v25, %v1165_v28  ;;  %v1173_v31 = vmul.f32 %v1169_v26, %v1166_v29  ;;  %v2760_v25 = vor.u32 %v2969_v22, %v2757_v24  ;;  %v2675_v26 = vld [vmem:[#allocation19 + $0x20] sm:$0xf]  ;;  %v2949_v28 = vld [vmem:[#allocation19 + $0x24] sm:$0xf] }
 0x506   :  { %v2676_v29 = vor.u32 %v2950_v27, %v2675_v26 }
 0x507   :  { %v1174_v4 = vpack.c.bf16 %v1172_v30, %v1172_v30  ;;  %v1175_v32 = vpack.c.bf16 %v1173_v31, %v1173_v31  ;;  %v2677_v30 = vld [vmem:[#allocation19 + $0x28] sm:$0xf0] }
 0x508   :  { %v2680_v31 = vor.u32 %v2949_v28, %v2677_v30 }
 0x509   :  { %1568 = vmatmul.bf16.vlgmr.msra.gmra.mxu0 %v1174_v4  ;;  %1581 = vmatmul.bf16.vlgmr.msra.gmra.mxu1 %v1175_v32 }
 0x50a   :  { %1594 = vmatmul.bf16.vlgmr.msra.gmra.mxu2 %v1174_v4  ;;  %1607 = vmatmul.bf16.vlgmr.msra.gmra.mxu3 %v1175_v32 }
 0x50b   :  { %1900 = vmatpush.bf16.msra.mxu0 %v2716_v36  ;;  %1926 = vmatpush.bf16.msra.mxu2 %v2720_v38  ;;  %v2752_v36 = vor.u32 %v2967_v33, %v2749_v35  ;;  %v2948_v38 = vld [vmem:[#allocation19 + $0x14] sm:$0xf0] }
 0x50c   :  { %1913 = vmatpush.bf16.msra.mxu1 %v2780_v48  ;;  %1939 = vmatpush.bf16.msra.mxu3 %v2784_v51  ;;  %v2668_v0 = vor.u32 %v2948_v38, %v2667_v37 }
 0x50f   :  { %1901 = vmatpush.bf16.msra.mxu0 %v2708_v1  ;;  %1927 = vmatpush.bf16.msra.mxu2 %v2712_v44  ;;  %v2672_v1 = vor.u32 %v2947_v40, %v2669_v41  ;;  %v2966_v44 = vld [vmem:[#allocation19 + $0xa4] sm:$0xf0] }
 0x510   :  { %1914 = vmatpush.bf16.msra.mxu1 %v2772_v60  ;;  %1940 = vmatpush.bf16.msra.mxu3 %v2776_v62  ;;  %v2740_v48 = vor.u32 %v2966_v44, %v2739_v43  ;;  %v2964_v60 = vld [vmem:[#allocation19 + $0x94] sm:$0xf0]  ;;  %v2963_v62 = vld [vmem:[#allocation19 + $0x94] sm:$0xf] }
 0x511   :  { %v2732_v61 = vor.u32 %v2964_v60, %v2731_v59  ;;  %v2736_v2 = vor.u32 %v2963_v62, %v2733_v39 }
 0x513   :  { %1902 = vmatpush.bf16.msra.mxu0 %v2700_v16  ;;  %1928 = vmatpush.bf16.msra.mxu2 %v2704_v56  ;;  %v2945_v16 = vld [vmem:[#allocation19 + $0x4] sm:$0xf]  ;;  %v2661_v56 = vld [vmem:[#allocation19 + $0x8] sm:$0xf0] }
 0x514   :  { %1915 = vmatpush.bf16.msra.mxu1 %v2764_v11  ;;  %1941 = vmatpush.bf16.msra.mxu3 %v2768_v13  ;;  %v2664_v58 = vor.u32 %v2945_v16, %v2661_v56  ;;  %v2725_v13 = vld [vmem:[#allocation19 + $0x88] sm:$0xf0] }
 0x515   :  { %v2728_v14 = vor.u32 %v2961_v8, %v2725_v13 }
 0x517   :  { %1903 = vmatpush.bf16.msra.mxu0 %v2692_v5  ;;  %1929 = vmatpush.bf16.msra.mxu2 %v2696_v7  ;;  %v2962_v7 = vld [vmem:[#allocation19 + $0x84] sm:$0xf0] }
 0x518   :  { %1916 = vmatpush.bf16.msra.mxu1 %v2756_v23  ;;  %1942 = vmatpush.bf16.msra.mxu3 %v2760_v25  ;;  %v2724_v12 = vor.u32 %v2962_v7, %v2723_v6 }
 0x519   :  { %1620 = vmatmul.bf16.vlgmr.msrb.gmra.mxu0 %v1174_v4  ;;  %1633 = vmatmul.bf16.vlgmr.msrb.gmra.mxu1 %v1175_v32 }
 0x51a   :  { %1646 = vmatmul.bf16.vlgmr.msrb.gmra.mxu2 %v1174_v4  ;;  %1659 = vmatmul.bf16.vlgmr.msrb.gmra.mxu3 %v1175_v32  ;;  %v2747_v4 = vld [vmem:[#allocation19 + $0xb0] sm:$0xf]  ;;  %v2968_v32 = vld [vmem:[#allocation19 + $0xb4] sm:$0xf0] }
 0x51b   :  { %1904 = vmatpush.bf16.msra.mxu0 %v2684_v17  ;;  %1930 = vmatpush.bf16.msra.mxu2 %v2688_v19  ;;  %v2748_v34 = vor.u32 %v2968_v32, %v2747_v4 }
 0x51c   :  { %1943 = vmatpush.bf16.msra.mxu3 %v2752_v36 }
 0x51d   :  { %1917 = vmatpush.bf16.msra.mxu1 %v2748_v34 }
 0x51f   :  { %1905 = vmatpush.bf16.msra.mxu0 %v2676_v29  ;;  %1931 = vmatpush.bf16.msra.mxu2 %v2680_v31 }
 0x520   :  { %1944 = vmatpush.bf16.msra.mxu3 %v2744_v52 }
 0x521   :  { %1918 = vmatpush.bf16.msra.mxu1 %v2740_v48 }
 0x523   :  { %1906 = vmatpush.bf16.msra.mxu0 %v2668_v0  ;;  %1932 = vmatpush.bf16.msra.mxu2 %v2672_v1 }
 0x524   :  { %1945 = vmatpush.bf16.msra.mxu3 %v2736_v2 }
 0x525   :  { %1919 = vmatpush.bf16.msra.mxu1 %v2732_v61 }
 0x527   :  { %1907 = vmatpush.bf16.msra.mxu0 %v2660_v55  ;;  %1933 = vmatpush.bf16.msra.mxu2 %v2664_v58 }
 0x528   :  { %1946 = vmatpush.bf16.msra.mxu3 %v2728_v14 }
 0x529   :  { %1920 = vmatpush.bf16.msra.mxu1 %v2724_v12 }
 0x586   :  { %v1569_v46 = vpop.f32.mrf.mxu0  ;;  %v1582_v42 = vpop.f32.mrf.mxu1 }
 0x587   :  { %v3583_v51 = vadd.f32 %v1582_v42, %v1569_v46 }
 0x589   :  { %v2655_v57 = vmul.f32 -1.442695, %v3583_v51 }
 0x58b   :  { %3012 = vpow2.f32 %v2655_v57 }
 0x58d   :  { %v1595_v3 = vpop.f32.mrf.mxu2  ;;  %v1608_v5 = vpop.f32.mrf.mxu3 }
 0x58e   :  { %v1609_v9 = vadd.f32 %v1608_v5, %v1595_v3  ;;  %v1571_v10 = vpop.f32.mrf.mxu0  ;;  %v1584_v11 = vpop.f32.mrf.mxu1 }
 0x590   :  { %v2656_v15 = vmul.f32 -1.442695, %v1609_v9 }
 0x591   :  { %v3013_v63 = vpop.eup %3012 }
 0x592   :  { %v1670_v17 = vadd.f32 1.0, %v3013_v63  ;;  %3014 = vpow2.f32 %v2656_v15 }
 0x594   :  { %3016 = vrcp.f32 %v1670_v17  ;;  %v1683_v29 = vand.u32 2147483648, %v1670_v17  ;;  %v1681_v32 = vand.u32 2147483647, %v1670_v17  ;;  %vm1677_vm13 = vweird.f32 %v1670_v17 }
 0x595   :  { %v1597_v18 = vpop.f32.mrf.mxu2  ;;  %v1610_v19 = vpop.f32.mrf.mxu3 }
 0x596   :  { %v1621_v20 = vpop.f32.mrf.mxu0  ;;  %v1634_v21 = vpop.f32.mrf.mxu1  ;;  %v1684_v35 = vor.u32 1.1754944e-38, %v1683_v29  ;;  %vm1682_vm15 = vcmp.eq.f32.partialorder %v1681_v32, 8.507059e+37 }
 0x597   :  { %v1635_v1 = vadd.f32 %v1634_v21, %v1621_v20 }
 0x598   :  { %v3015_v22 = vpop.eup %3014 }
 0x599   :  { %v1671_v23 = vadd.f32 1.0, %v3015_v22 }
 0x59a   :  { %v3017_v24 = vpop.eup %3016 }
 0x59b   :  { %v1673_v25 = vmul.f32 %v3017_v24, %v1670_v17  ;;  %3018 = vrcp.f32 %v1671_v23  ;;  %vm1678_vm12 = vweird.f32 %v3017_v24  ;;  %v1698_v41 = vand.u32 2147483648, %v1671_v23 }
 0x59c   :  { %vm1679_vm14 = vmor %vm1677_vm13, %vm1678_vm12  ;;  %v1696_v46 = vand.u32 2147483647, %v1671_v23  ;;  %vm1692_vm1 = vweird.f32 %v1671_v23 }
 0x59d   :  { %v1674_v26 = vsub.f32 1.0, %v1673_v25  ;;  %v1647_v27 = vpop.f32.mrf.mxu2  ;;  %v1660_v28 = vpop.f32.mrf.mxu3  ;;  %v1699_v49 = vor.u32 1.1754944e-38, %v1698_v41 }
 0x59e   :  { %v1623_v30 = vpop.f32.mrf.mxu0  ;;  %v1636_v31 = vpop.f32.mrf.mxu1  ;;  %vm1697_vm3 = vcmp.eq.f32.partialorder %v1696_v46, 8.507059e+37 }
 0x59f   :  { %v1675_v4 = vmul.f32 %v3017_v24, %v1674_v26 }
 0x5a1   :  { %v3019_v33 = vpop.eup %3018  ;;  %v1676_v34 = vadd.f32 %v3017_v24, %v1675_v4 }
 0x5a2   :  { %v1688_v36 = vmul.f32 %v3019_v33, %v1671_v23  ;;  %vm1693_vm0 = vweird.f32 %v3019_v33 }
 0x5a3   :  { %v1680_v37 = vsel %vm1679_vm14, %v3017_v24, %v1676_v34  ;;  %vm1694_vm2 = vmor %vm1692_vm1, %vm1693_vm0 }
 0x5a4   :  { %v1685_v38 = vsel %vm1682_vm15, %v1684_v35, %v1680_v37  ;;  %v1689_v40 = vsub.f32 1.0, %v1688_v36 }
 0x5a5   :  { %v1702_v0 = vmul.f32 %v1685_v38, %v3583_v51  ;;  %v1649_v43 = vpop.f32.mrf.mxu2  ;;  %v1662_v44 = vpop.f32.mrf.mxu3  ;;  %v1661_v51 = vadd.f32 %v1660_v28, %v1647_v27 }
 0x5a6   :  { %v1690_v45 = vmul.f32 %v3019_v33, %v1689_v40 }
 0x5a7   :  { %v1704_v42 = vmul.f32 %v1702_v0, %v1635_v1 }
 0x5a8   :  { %v1691_v48 = vadd.f32 %v3019_v33, %v1690_v45 }
 0x5a9   :  { %v1706_v52 = vpack.c.bf16 %v1704_v42, %v1704_v42 }
 0x5aa   :  { %v1695_v53 = vsel %vm1694_vm2, %v3019_v33, %v1691_v48 }
 0x5ab   :  { %v1700_v54 = vsel %vm1697_vm3, %v1699_v49, %v1695_v53  ;;  %1908 = vmatmul.bf16.vlgmr.msra.gmra.mxu0 %v1706_v52  ;;  %1934 = vmatmul.bf16.vlgmr.msra.gmra.mxu2 %v1706_v52 }
 0x5ac   :  { %v1703_v16 = vmul.f32 %v1700_v54, %v1609_v9 }
 0x5ae   :  { %v1705_v55 = vmul.f32 %v1703_v16, %v1661_v51 }
 0x5b0   :  { %v1707_v56 = vpack.c.bf16 %v1705_v55, %v1705_v55 }
 0x5b2   :  { %1921 = vmatmul.bf16.vlgmr.msra.gmra.mxu1 %v1707_v56  ;;  %1947 = vmatmul.bf16.vlgmr.msra.gmra.mxu3 %v1707_v56 }
 0x628   :  { %v1909_v57 = vpop.f32.mrf.mxu0 }
 0x62e   :  { %v1935_v58 = vpop.f32.mrf.mxu2 }
 0x62f   :  { %v1922_v59 = vpop.f32.mrf.mxu1 }
 0x630   :  { %v1923_v60 = vadd.f32 %v1922_v59, %v1909_v57  ;;  %v1911_v61 = vpop.f32.mrf.mxu0 }
 0x632   :  { %v1952_v62 = vadd.f32 %v1923_v60, %v3569_v47 }
 0x634   :  { %1954 = vst [vmem:[#allocation20] sm:$0xff] %v1952_v62 }
 0x635   :  { %v1948_v39 = vpop.f32.mrf.mxu3 }
 0x636   :  { %v1949_v2 = vadd.f32 %v1948_v39, %v1935_v58  ;;  %v1937_v3 = vpop.f32.mrf.mxu2 }
 0x637   :  { %v1924_v5 = vpop.f32.mrf.mxu1 }
 0x638   :  { %v1953_v6 = vadd.f32 %v1949_v2, %v3571_v50 }
 0x63a   :  { %1955 = vst [vmem:[#allocation20 + $0x8] sm:$0xff] %v1953_v6 }
 0x63b   :  { %1966 = dma.vmem_to_hbm [thread:$0]  %s1962_s4, 256, %s1964_s16, [#allocation4]  }
 0x63d   :  { %v1950_v7 = vpop.f32.mrf.mxu3 }
 0x63e   :  { %3370 = dma.done.wait [#allocation4], 256  }
 0x63f   :  { %3371 = vsyncadd [#allocation4], 4294967040 }
 0x640   :  { %3372 = dma.done.wait [#allocation22], 512  }
 0x641   :  { %3373 = vsyncadd [#allocation22], 4294966784 }
 0x642   :  { %2005 = vsyncpa [#allocation3], 1 }
 0x643   :  { %2006 = vsyncpa [#allocation6], 1 }
 0x644   :  { %2007 = vsyncpa [#allocation9], 1 }
 0x645   :  { %2008 = vsyncpa [#allocation12], 1 }
 0x646   :  { %2009 = vsyncpa [#allocation15], 1 }
 0x647   :  { %2010 = vsyncpa [#allocation18], 1 }
 0x648   :  { %2011 = vsyncpa [#allocation4], 1 }
 0x649   :  { %2012 = vsyncpa [#allocation22], 1 }

</bundles_post_ra>
